<compile_context>
chip_gen: v5e
topology: v5e:2x2
jax: 0.10.0
libtpu: 0.0.40
codegen_flags: <defaults>
</compile_context>

<pallas_src>
import math
import numpy as np
import jax
import jax.numpy as jnp
from jax.experimental import pallas as pl
from jax.experimental.pallas import tpu as pltpu


def gru_recurrence_kernel(xp_ref, wh_ref, bhn_ref, out_ref, hout_ref):
    """Serial GRU recurrence, everything VMEM-resident.

    xp_ref:  (B, T, 3H)  pre-activations  x @ W_i + (b_ir+b_hr | b_iz+b_hz | b_in)
    wh_ref:  (H, 3H)     fused recurrent weights [W_hr | W_hz | W_hn] (transposed)
    bhn_ref: (1, H)      b_hn (must stay inside r * (.), cannot be pre-fused)
    out_ref: (B, T, H)   all hidden states (written per step in VMEM, one DMA out)
    hout_ref:(B, H)      final hidden state
    """
    B, T, G = xp_ref.shape
    H = G // 3

    wh = wh_ref[...]      # loaded once, stays resident for the whole recurrence
    bhn = bhn_ref[...]    # (1, H)

    h = jnp.zeros((B, H), jnp.float32)
    # T is small and static -> fully unrolled serial loop, no grid/pipeline machinery.
    for t in range(T):
        xg = xp_ref[:, t, :]                                          # (B, 3H)
        hg = jnp.dot(h, wh, preferred_element_type=jnp.float32)       # single fused matmul
        # PyTorch GRU gate equations (gate order r, z, n):
        r = jax.nn.sigmoid(xg[:, 0:H] + hg[:, 0:H])
        z = jax.nn.sigmoid(xg[:, H:2 * H] + hg[:, H:2 * H])
        n = jnp.tanh(xg[:, 2 * H:] + r * (hg[:, 2 * H:] + bhn))
        h = (1.0 - z) * n + z * h
        out_ref[:, t, :] = h.astype(out_ref.dtype)

    hout_ref[...] = h.astype(hout_ref.dtype)


def encoder_forward(x, params):
    """x: (B, T, D) float32 (batch_first). Returns (encoder_ops (B, T, H), h_n (B, H))."""
    B, T, D = x.shape
    H = params["w_hh"].shape[0]

    # Hoisted input projection: one big parallel matmul over all B*T tokens.
    # r/z biases are pre-fused (b_ir+b_hr, b_iz+b_hz) and b_in is folded in too.
    xp = (jnp.dot(x.reshape(B * T, D), params["w_ih"],
                  preferred_element_type=jnp.float32)
          + params["b_i"]).reshape(B, T, 3 * H)

    vmem = pl.BlockSpec(memory_space=pltpu.MemorySpace.VMEM)
    out, h_n = pl.pallas_call(
        gru_recurrence_kernel,
        out_shape=(jax.ShapeDtypeStruct((B, T, H), jnp.float32),
                   jax.ShapeDtypeStruct((B, H), jnp.float32)),
        in_specs=[vmem, vmem, vmem],
        out_specs=(vmem, vmem),
    )(xp, params["w_hh"], params["b_hn"])
    return out, h_n


def init_gru_params(key, d_model, hidden_size):
    """Raw PyTorch nn.GRU-layout params: U(-1/sqrt(H), 1/sqrt(H)), gate order [r, z, n]."""
    k = 1.0 / math.sqrt(hidden_size)
    ks = jax.random.split(key, 4)
    return {
        "w_ih": jax.random.uniform(ks[0], (3 * hidden_size, d_model), jnp.float32, -k, k),
        "w_hh": jax.random.uniform(ks[1], (3 * hidden_size, hidden_size), jnp.float32, -k, k),
        "b_ih": jax.random.uniform(ks[2], (3 * hidden_size,), jnp.float32, -k, k),
        "b_hh": jax.random.uniform(ks[3], (3 * hidden_size,), jnp.float32, -k, k),
    }


def prepare_kernel_params(raw):
    """Fuse raw PyTorch-layout weights for the kernel (transposed, gate-concatenated)."""
    H = raw["w_hh"].shape[1]
    b_i = jnp.concatenate([
        raw["b_ih"][0:H] + raw["b_hh"][0:H],            # r: b_ir + b_hr
        raw["b_ih"][H:2 * H] + raw["b_hh"][H:2 * H],    # z: b_iz + b_hz
        raw["b_ih"][2 * H:3 * H],                       # n: b_in (b_hn stays separate)
    ]).reshape(1, 3 * H)
    return {
        "w_ih": raw["w_ih"].T,                          # (D, 3H), column blocks [r | z | n]
        "w_hh": raw["w_hh"].T,                          # (H, 3H)
        "b_i": b_i,                                     # (1, 3H)
        "b_hn": raw["b_hh"][2 * H:3 * H].reshape(1, H), # (1, H)
    }


def gru_reference(x, raw):
    """Pure-JAX reference with PyTorch nn.GRU semantics, from the raw (untransposed) params."""
    w_ih, w_hh, b_ih, b_hh = raw["w_ih"], raw["w_hh"], raw["b_ih"], raw["b_hh"]
    H = w_hh.shape[1]
    B, T, D = x.shape
    wir, wiz, win = w_ih[0:H], w_ih[H:2 * H], w_ih[2 * H:]
    whr, whz, whn = w_hh[0:H], w_hh[H:2 * H], w_hh[2 * H:]
    bir, biz, bin_ = b_ih[0:H], b_ih[H:2 * H], b_ih[2 * H:]
    bhr, bhz, bhn = b_hh[0:H], b_hh[H:2 * H], b_hh[2 * H:]

    h = jnp.zeros((B, H), jnp.float32)
    outs = []
    for t in range(T):
        x_t = x[:, t, :]
        r = jax.nn.sigmoid(x_t @ wir.T + bir + h @ whr.T + bhr)
        z = jax.nn.sigmoid(x_t @ wiz.T + biz + h @ whz.T + bhz)
        n = jnp.tanh(x_t @ win.T + bin_ + r * (h @ whn.T + bhn))
        h = (1.0 - z) * n + z * h
        outs.append(h)
    return jnp.stack(outs, axis=1), h


if __name__ == "__main__":
    # Small shapes consistent with the module: batch=2, seq=8, d_model=32, hidden=32
    B, T, D, H = 2, 8, 32, 32

    key = jax.random.PRNGKey(0)
    k_x, k_p = jax.random.split(key)
    x = jax.random.normal(k_x, (B, T, D), jnp.float32)
    raw = init_gru_params(k_p, D, H)
    params = prepare_kernel_params(raw)

    fwd = jax.jit(encoder_forward)
    encoder_ops, encoder_hidden = fwd(x, params)
    jax.block_until_ready((encoder_ops, encoder_hidden))

    ref_ops, ref_h = gru_reference(x, raw)
    np.testing.assert_allclose(np.asarray(encoder_ops), np.asarray(ref_ops),
                               atol=1e-5, rtol=1e-5)
    np.testing.assert_allclose(np.asarray(encoder_hidden), np.asarray(ref_h),
                               atol=1e-5, rtol=1e-5)

    assert encoder_ops.shape == (B, T, H)
    assert encoder_hidden.shape == (B, H)
    print("KERNEL_OK")
</pallas_src>

<mosaic_0001>
module attributes {stable_mosaic.version = 11 : i64} {
  func.func @gru_recurrence_kernel(%arg0: memref<2x8x96xf32, #tpu.memory_space<vmem>>, %arg1: memref<32x96xf32, #tpu.memory_space<vmem>>, %arg2: memref<1x32xf32, #tpu.memory_space<vmem>>, %arg3: memref<2x8x32xf32, #tpu.memory_space<vmem>>, %arg4: memref<2x32xf32, #tpu.memory_space<vmem>>) attributes {dimension_semantics = [], scalar_prefetch = 0 : i64, scratch_operands = 0 : i64, tpu.core_type = #tpu.core_type<tc>} {
    %c0 = arith.constant 0 : index
    %c0_0 = arith.constant 0 : index
    %0 = vector.load %arg1[%c0, %c0_0] : memref<32x96xf32, #tpu.memory_space<vmem>>, vector<32x96xf32>
    %c0_1 = arith.constant 0 : index
    %c0_2 = arith.constant 0 : index
    %1 = vector.load %arg2[%c0_1, %c0_2] : memref<1x32xf32, #tpu.memory_space<vmem>>, vector<1x32xf32>
    %cst = arith.constant 0.000000e+00 : f32
    %2 = vector.broadcast %cst : f32 to vector<2x32xf32>
    %c0_3 = arith.constant 0 : index
    %c0_4 = arith.constant 0 : index
    %c0_5 = arith.constant 0 : index
    %3 = vector.load %arg0[%c0_3, %c0_4, %c0_5] : memref<2x8x96xf32, #tpu.memory_space<vmem>>, vector<2x1x96xf32>
    %4 = vector.shape_cast %3 : vector<2x1x96xf32> to vector<2x96xf32>
    %cst_6 = arith.constant dense<0.000000e+00> : vector<2x96xf32>
    %5 = tpu.matmul %2, %0, %cst_6 {dimension_numbers = #tpu.dot_dimension_numbers<[1], [0], [0], [1], [0, 0, 1, 1], [], []>} : vector<2x32xf32>, vector<32x96xf32>, vector<2x96xf32> -> vector<2x96xf32>
    %6 = vector.extract_strided_slice %4 {offsets = [0, 0], sizes = [2, 32], strides = [1, 1]} : vector<2x96xf32> to vector<2x32xf32>
    %7 = vector.extract_strided_slice %5 {offsets = [0, 0], sizes = [2, 32], strides = [1, 1]} : vector<2x96xf32> to vector<2x32xf32>
    %8 = arith.addf %6, %7 : vector<2x32xf32>
    %9 = arith.negf %8 : vector<2x32xf32>
    %10 = math.exp %9 : vector<2x32xf32>
    %cst_7 = arith.constant 1.000000e+00 : f32
    %11 = vector.broadcast %cst_7 : f32 to vector<2x32xf32>
    %12 = arith.addf %11, %10 : vector<2x32xf32>
    %13 = arith.divf %11, %12 : vector<2x32xf32>
    %14 = vector.extract_strided_slice %4 {offsets = [0, 32], sizes = [2, 32], strides = [1, 1]} : vector<2x96xf32> to vector<2x32xf32>
    %15 = vector.extract_strided_slice %5 {offsets = [0, 32], sizes = [2, 32], strides = [1, 1]} : vector<2x96xf32> to vector<2x32xf32>
    %16 = arith.addf %14, %15 : vector<2x32xf32>
    %17 = arith.negf %16 : vector<2x32xf32>
    %18 = math.exp %17 : vector<2x32xf32>
    %cst_8 = arith.constant 1.000000e+00 : f32
    %19 = vector.broadcast %cst_8 : f32 to vector<2x32xf32>
    %20 = arith.addf %19, %18 : vector<2x32xf32>
    %21 = arith.divf %19, %20 : vector<2x32xf32>
    %22 = vector.extract_strided_slice %4 {offsets = [0, 64], sizes = [2, 32], strides = [1, 1]} : vector<2x96xf32> to vector<2x32xf32>
    %23 = vector.extract_strided_slice %5 {offsets = [0, 64], sizes = [2, 32], strides = [1, 1]} : vector<2x96xf32> to vector<2x32xf32>
    %24 = vector.broadcast %1 : vector<1x32xf32> to vector<2x32xf32>
    %25 = arith.addf %23, %24 : vector<2x32xf32>
    %26 = arith.mulf %13, %25 : vector<2x32xf32>
    %27 = arith.addf %22, %26 : vector<2x32xf32>
    %28 = math.tanh %27 : vector<2x32xf32>
    %cst_9 = arith.constant 1.000000e+00 : f32
    %29 = vector.broadcast %cst_9 : f32 to vector<2x32xf32>
    %30 = arith.subf %29, %21 : vector<2x32xf32>
    %31 = arith.mulf %30, %28 : vector<2x32xf32>
    %32 = arith.mulf %21, %2 : vector<2x32xf32>
    %33 = arith.addf %31, %32 : vector<2x32xf32>
    %c0_10 = arith.constant 0 : index
    %c0_11 = arith.constant 0 : index
    %c0_12 = arith.constant 0 : index
    %34 = vector.load %arg3[%c0_10, %c0_11, %c0_12] : memref<2x8x32xf32, #tpu.memory_space<vmem>>, vector<2x1x32xf32>
    %35 = vector.shape_cast %34 : vector<2x1x32xf32> to vector<2x32xf32>
    %36 = vector.shape_cast %33 : vector<2x32xf32> to vector<2x1x32xf32>
    tpu.vector_store %arg3[%c0_10, %c0_11, %c0_12], %36 {strides = array<i32>} : memref<2x8x32xf32, #tpu.memory_space<vmem>>, vector<2x1x32xf32>,
    %c0_13 = arith.constant 0 : index
    %c1 = arith.constant 1 : index
    %c0_14 = arith.constant 0 : index
    %37 = vector.load %arg0[%c0_13, %c1, %c0_14] : memref<2x8x96xf32, #tpu.memory_space<vmem>>, vector<2x1x96xf32>
    %38 = vector.shape_cast %37 : vector<2x1x96xf32> to vector<2x96xf32>
    %cst_15 = arith.constant dense<0.000000e+00> : vector<2x96xf32>
    %39 = tpu.matmul %33, %0, %cst_15 {dimension_numbers = #tpu.dot_dimension_numbers<[1], [0], [0], [1], [0, 0, 1, 1], [], []>} : vector<2x32xf32>, vector<32x96xf32>, vector<2x96xf32> -> vector<2x96xf32>
    %40 = vector.extract_strided_slice %38 {offsets = [0, 0], sizes = [2, 32], strides = [1, 1]} : vector<2x96xf32> to vector<2x32xf32>
    %41 = vector.extract_strided_slice %39 {offsets = [0, 0], sizes = [2, 32], strides = [1, 1]} : vector<2x96xf32> to vector<2x32xf32>
    %42 = arith.addf %40, %41 : vector<2x32xf32>
    %43 = arith.negf %42 : vector<2x32xf32>
    %44 = math.exp %43 : vector<2x32xf32>
    %cst_16 = arith.constant 1.000000e+00 : f32
    %45 = vector.broadcast %cst_16 : f32 to vector<2x32xf32>
    %46 = arith.addf %45, %44 : vector<2x32xf32>
    %47 = arith.divf %45, %46 : vector<2x32xf32>
    %48 = vector.extract_strided_slice %38 {offsets = [0, 32], sizes = [2, 32], strides = [1, 1]} : vector<2x96xf32> to vector<2x32xf32>
    %49 = vector.extract_strided_slice %39 {offsets = [0, 32], sizes = [2, 32], strides = [1, 1]} : vector<2x96xf32> to vector<2x32xf32>
    %50 = arith.addf %48, %49 : vector<2x32xf32>
    %51 = arith.negf %50 : vector<2x32xf32>
    %52 = math.exp %51 : vector<2x32xf32>
    %cst_17 = arith.constant 1.000000e+00 : f32
    %53 = vector.broadcast %cst_17 : f32 to vector<2x32xf32>
    %54 = arith.addf %53, %52 : vector<2x32xf32>
    %55 = arith.divf %53, %54 : vector<2x32xf32>
    %56 = vector.extract_strided_slice %38 {offsets = [0, 64], sizes = [2, 32], strides = [1, 1]} : vector<2x96xf32> to vector<2x32xf32>
    %57 = vector.extract_strided_slice %39 {offsets = [0, 64], sizes = [2, 32], strides = [1, 1]} : vector<2x96xf32> to vector<2x32xf32>
    %58 = vector.broadcast %1 : vector<1x32xf32> to vector<2x32xf32>
    %59 = arith.addf %57, %58 : vector<2x32xf32>
    %60 = arith.mulf %47, %59 : vector<2x32xf32>
    %61 = arith.addf %56, %60 : vector<2x32xf32>
    %62 = math.tanh %61 : vector<2x32xf32>
    %cst_18 = arith.constant 1.000000e+00 : f32
    %63 = vector.broadcast %cst_18 : f32 to vector<2x32xf32>
    %64 = arith.subf %63, %55 : vector<2x32xf32>
    %65 = arith.mulf %64, %62 : vector<2x32xf32>
    %66 = arith.mulf %55, %33 : vector<2x32xf32>
    %67 = arith.addf %65, %66 : vector<2x32xf32>
    %c0_19 = arith.constant 0 : index
    %c1_20 = arith.constant 1 : index
    %c0_21 = arith.constant 0 : index
    %68 = vector.load %arg3[%c0_19, %c1_20, %c0_21] : memref<2x8x32xf32, #tpu.memory_space<vmem>>, vector<2x1x32xf32>
    %69 = vector.shape_cast %68 : vector<2x1x32xf32> to vector<2x32xf32>
    %70 = vector.shape_cast %67 : vector<2x32xf32> to vector<2x1x32xf32>
    tpu.vector_store %arg3[%c0_19, %c1_20, %c0_21], %70 {strides = array<i32>} : memref<2x8x32xf32, #tpu.memory_space<vmem>>, vector<2x1x32xf32>,
    %c0_22 = arith.constant 0 : index
    %c2 = arith.constant 2 : index
    %c0_23 = arith.constant 0 : index
    %71 = vector.load %arg0[%c0_22, %c2, %c0_23] : memref<2x8x96xf32, #tpu.memory_space<vmem>>, vector<2x1x96xf32>
    %72 = vector.shape_cast %71 : vector<2x1x96xf32> to vector<2x96xf32>
    %cst_24 = arith.constant dense<0.000000e+00> : vector<2x96xf32>
    %73 = tpu.matmul %67, %0, %cst_24 {dimension_numbers = #tpu.dot_dimension_numbers<[1], [0], [0], [1], [0, 0, 1, 1], [], []>} : vector<2x32xf32>, vector<32x96xf32>, vector<2x96xf32> -> vector<2x96xf32>
    %74 = vector.extract_strided_slice %72 {offsets = [0, 0], sizes = [2, 32], strides = [1, 1]} : vector<2x96xf32> to vector<2x32xf32>
    %75 = vector.extract_strided_slice %73 {offsets = [0, 0], sizes = [2, 32], strides = [1, 1]} : vector<2x96xf32> to vector<2x32xf32>
    %76 = arith.addf %74, %75 : vector<2x32xf32>
    %77 = arith.negf %76 : vector<2x32xf32>
    %78 = math.exp %77 : vector<2x32xf32>
    %cst_25 = arith.constant 1.000000e+00 : f32
    %79 = vector.broadcast %cst_25 : f32 to vector<2x32xf32>
    %80 = arith.addf %79, %78 : vector<2x32xf32>
    %81 = arith.divf %79, %80 : vector<2x32xf32>
    %82 = vector.extract_strided_slice %72 {offsets = [0, 32], sizes = [2, 32], strides = [1, 1]} : vector<2x96xf32> to vector<2x32xf32>
    %83 = vector.extract_strided_slice %73 {offsets = [0, 32], sizes = [2, 32], strides = [1, 1]} : vector<2x96xf32> to vector<2x32xf32>
    %84 = arith.addf %82, %83 : vector<2x32xf32>
    %85 = arith.negf %84 : vector<2x32xf32>
    %86 = math.exp %85 : vector<2x32xf32>
    %cst_26 = arith.constant 1.000000e+00 : f32
    %87 = vector.broadcast %cst_26 : f32 to vector<2x32xf32>
    %88 = arith.addf %87, %86 : vector<2x32xf32>
    %89 = arith.divf %87, %88 : vector<2x32xf32>
    %90 = vector.extract_strided_slice %72 {offsets = [0, 64], sizes = [2, 32], strides = [1, 1]} : vector<2x96xf32> to vector<2x32xf32>
    %91 = vector.extract_strided_slice %73 {offsets = [0, 64], sizes = [2, 32], strides = [1, 1]} : vector<2x96xf32> to vector<2x32xf32>
    %92 = vector.broadcast %1 : vector<1x32xf32> to vector<2x32xf32>
    %93 = arith.addf %91, %92 : vector<2x32xf32>
    %94 = arith.mulf %81, %93 : vector<2x32xf32>
    %95 = arith.addf %90, %94 : vector<2x32xf32>
    %96 = math.tanh %95 : vector<2x32xf32>
    %cst_27 = arith.constant 1.000000e+00 : f32
    %97 = vector.broadcast %cst_27 : f32 to vector<2x32xf32>
    %98 = arith.subf %97, %89 : vector<2x32xf32>
    %99 = arith.mulf %98, %96 : vector<2x32xf32>
    %100 = arith.mulf %89, %67 : vector<2x32xf32>
    %101 = arith.addf %99, %100 : vector<2x32xf32>
    %c0_28 = arith.constant 0 : index
    %c2_29 = arith.constant 2 : index
    %c0_30 = arith.constant 0 : index
    %102 = vector.load %arg3[%c0_28, %c2_29, %c0_30] : memref<2x8x32xf32, #tpu.memory_space<vmem>>, vector<2x1x32xf32>
    %103 = vector.shape_cast %102 : vector<2x1x32xf32> to vector<2x32xf32>
    %104 = vector.shape_cast %101 : vector<2x32xf32> to vector<2x1x32xf32>
    tpu.vector_store %arg3[%c0_28, %c2_29, %c0_30], %104 {strides = array<i32>} : memref<2x8x32xf32, #tpu.memory_space<vmem>>, vector<2x1x32xf32>,
    %c0_31 = arith.constant 0 : index
    %c3 = arith.constant 3 : index
    %c0_32 = arith.constant 0 : index
    %105 = vector.load %arg0[%c0_31, %c3, %c0_32] : memref<2x8x96xf32, #tpu.memory_space<vmem>>, vector<2x1x96xf32>
    %106 = vector.shape_cast %105 : vector<2x1x96xf32> to vector<2x96xf32>
    %cst_33 = arith.constant dense<0.000000e+00> : vector<2x96xf32>
    %107 = tpu.matmul %101, %0, %cst_33 {dimension_numbers = #tpu.dot_dimension_numbers<[1], [0], [0], [1], [0, 0, 1, 1], [], []>} : vector<2x32xf32>, vector<32x96xf32>, vector<2x96xf32> -> vector<2x96xf32>
    %108 = vector.extract_strided_slice %106 {offsets = [0, 0], sizes = [2, 32], strides = [1, 1]} : vector<2x96xf32> to vector<2x32xf32>
    %109 = vector.extract_strided_slice %107 {offsets = [0, 0], sizes = [2, 32], strides = [1, 1]} : vector<2x96xf32> to vector<2x32xf32>
    %110 = arith.addf %108, %109 : vector<2x32xf32>
    %111 = arith.negf %110 : vector<2x32xf32>
    %112 = math.exp %111 : vector<2x32xf32>
    %cst_34 = arith.constant 1.000000e+00 : f32
    %113 = vector.broadcast %cst_34 : f32 to vector<2x32xf32>
    %114 = arith.addf %113, %112 : vector<2x32xf32>
    %115 = arith.divf %113, %114 : vector<2x32xf32>
    %116 = vector.extract_strided_slice %106 {offsets = [0, 32], sizes = [2, 32], strides = [1, 1]} : vector<2x96xf32> to vector<2x32xf32>
    %117 = vector.extract_strided_slice %107 {offsets = [0, 32], sizes = [2, 32], strides = [1, 1]} : vector<2x96xf32> to vector<2x32xf32>
    %118 = arith.addf %116, %117 : vector<2x32xf32>
    %119 = arith.negf %118 : vector<2x32xf32>
    %120 = math.exp %119 : vector<2x32xf32>
    %cst_35 = arith.constant 1.000000e+00 : f32
    %121 = vector.broadcast %cst_35 : f32 to vector<2x32xf32>
    %122 = arith.addf %121, %120 : vector<2x32xf32>
    %123 = arith.divf %121, %122 : vector<2x32xf32>
    %124 = vector.extract_strided_slice %106 {offsets = [0, 64], sizes = [2, 32], strides = [1, 1]} : vector<2x96xf32> to vector<2x32xf32>
    %125 = vector.extract_strided_slice %107 {offsets = [0, 64], sizes = [2, 32], strides = [1, 1]} : vector<2x96xf32> to vector<2x32xf32>
    %126 = vector.broadcast %1 : vector<1x32xf32> to vector<2x32xf32>
    %127 = arith.addf %125, %126 : vector<2x32xf32>
    %128 = arith.mulf %115, %127 : vector<2x32xf32>
    %129 = arith.addf %124, %128 : vector<2x32xf32>
    %130 = math.tanh %129 : vector<2x32xf32>
    %cst_36 = arith.constant 1.000000e+00 : f32
    %131 = vector.broadcast %cst_36 : f32 to vector<2x32xf32>
    %132 = arith.subf %131, %123 : vector<2x32xf32>
    %133 = arith.mulf %132, %130 : vector<2x32xf32>
    %134 = arith.mulf %123, %101 : vector<2x32xf32>
    %135 = arith.addf %133, %134 : vector<2x32xf32>
    %c0_37 = arith.constant 0 : index
    %c3_38 = arith.constant 3 : index
    %c0_39 = arith.constant 0 : index
    %136 = vector.load %arg3[%c0_37, %c3_38, %c0_39] : memref<2x8x32xf32, #tpu.memory_space<vmem>>, vector<2x1x32xf32>
    %137 = vector.shape_cast %136 : vector<2x1x32xf32> to vector<2x32xf32>
    %138 = vector.shape_cast %135 : vector<2x32xf32> to vector<2x1x32xf32>
    tpu.vector_store %arg3[%c0_37, %c3_38, %c0_39], %138 {strides = array<i32>} : memref<2x8x32xf32, #tpu.memory_space<vmem>>, vector<2x1x32xf32>,
    %c0_40 = arith.constant 0 : index
    %c4 = arith.constant 4 : index
    %c0_41 = arith.constant 0 : index
    %139 = vector.load %arg0[%c0_40, %c4, %c0_41] : memref<2x8x96xf32, #tpu.memory_space<vmem>>, vector<2x1x96xf32>
    %140 = vector.shape_cast %139 : vector<2x1x96xf32> to vector<2x96xf32>
    %cst_42 = arith.constant dense<0.000000e+00> : vector<2x96xf32>
    %141 = tpu.matmul %135, %0, %cst_42 {dimension_numbers = #tpu.dot_dimension_numbers<[1], [0], [0], [1], [0, 0, 1, 1], [], []>} : vector<2x32xf32>, vector<32x96xf32>, vector<2x96xf32> -> vector<2x96xf32>
    %142 = vector.extract_strided_slice %140 {offsets = [0, 0], sizes = [2, 32], strides = [1, 1]} : vector<2x96xf32> to vector<2x32xf32>
    %143 = vector.extract_strided_slice %141 {offsets = [0, 0], sizes = [2, 32], strides = [1, 1]} : vector<2x96xf32> to vector<2x32xf32>
    %144 = arith.addf %142, %143 : vector<2x32xf32>
    %145 = arith.negf %144 : vector<2x32xf32>
    %146 = math.exp %145 : vector<2x32xf32>
    %cst_43 = arith.constant 1.000000e+00 : f32
    %147 = vector.broadcast %cst_43 : f32 to vector<2x32xf32>
    %148 = arith.addf %147, %146 : vector<2x32xf32>
    %149 = arith.divf %147, %148 : vector<2x32xf32>
    %150 = vector.extract_strided_slice %140 {offsets = [0, 32], sizes = [2, 32], strides = [1, 1]} : vector<2x96xf32> to vector<2x32xf32>
    %151 = vector.extract_strided_slice %141 {offsets = [0, 32], sizes = [2, 32], strides = [1, 1]} : vector<2x96xf32> to vector<2x32xf32>
    %152 = arith.addf %150, %151 : vector<2x32xf32>
    %153 = arith.negf %152 : vector<2x32xf32>
    %154 = math.exp %153 : vector<2x32xf32>
    %cst_44 = arith.constant 1.000000e+00 : f32
    %155 = vector.broadcast %cst_44 : f32 to vector<2x32xf32>
    %156 = arith.addf %155, %154 : vector<2x32xf32>
    %157 = arith.divf %155, %156 : vector<2x32xf32>
    %158 = vector.extract_strided_slice %140 {offsets = [0, 64], sizes = [2, 32], strides = [1, 1]} : vector<2x96xf32> to vector<2x32xf32>
    %159 = vector.extract_strided_slice %141 {offsets = [0, 64], sizes = [2, 32], strides = [1, 1]} : vector<2x96xf32> to vector<2x32xf32>
    %160 = vector.broadcast %1 : vector<1x32xf32> to vector<2x32xf32>
    %161 = arith.addf %159, %160 : vector<2x32xf32>
    %162 = arith.mulf %149, %161 : vector<2x32xf32>
    %163 = arith.addf %158, %162 : vector<2x32xf32>
    %164 = math.tanh %163 : vector<2x32xf32>
    %cst_45 = arith.constant 1.000000e+00 : f32
    %165 = vector.broadcast %cst_45 : f32 to vector<2x32xf32>
    %166 = arith.subf %165, %157 : vector<2x32xf32>
    %167 = arith.mulf %166, %164 : vector<2x32xf32>
    %168 = arith.mulf %157, %135 : vector<2x32xf32>
    %169 = arith.addf %167, %168 : vector<2x32xf32>
    %c0_46 = arith.constant 0 : index
    %c4_47 = arith.constant 4 : index
    %c0_48 = arith.constant 0 : index
    %170 = vector.load %arg3[%c0_46, %c4_47, %c0_48] : memref<2x8x32xf32, #tpu.memory_space<vmem>>, vector<2x1x32xf32>
    %171 = vector.shape_cast %170 : vector<2x1x32xf32> to vector<2x32xf32>
    %172 = vector.shape_cast %169 : vector<2x32xf32> to vector<2x1x32xf32>
    tpu.vector_store %arg3[%c0_46, %c4_47, %c0_48], %172 {strides = array<i32>} : memref<2x8x32xf32, #tpu.memory_space<vmem>>, vector<2x1x32xf32>,
    %c0_49 = arith.constant 0 : index
    %c5 = arith.constant 5 : index
    %c0_50 = arith.constant 0 : index
    %173 = vector.load %arg0[%c0_49, %c5, %c0_50] : memref<2x8x96xf32, #tpu.memory_space<vmem>>, vector<2x1x96xf32>
    %174 = vector.shape_cast %173 : vector<2x1x96xf32> to vector<2x96xf32>
    %cst_51 = arith.constant dense<0.000000e+00> : vector<2x96xf32>
    %175 = tpu.matmul %169, %0, %cst_51 {dimension_numbers = #tpu.dot_dimension_numbers<[1], [0], [0], [1], [0, 0, 1, 1], [], []>} : vector<2x32xf32>, vector<32x96xf32>, vector<2x96xf32> -> vector<2x96xf32>
    %176 = vector.extract_strided_slice %174 {offsets = [0, 0], sizes = [2, 32], strides = [1, 1]} : vector<2x96xf32> to vector<2x32xf32>
    %177 = vector.extract_strided_slice %175 {offsets = [0, 0], sizes = [2, 32], strides = [1, 1]} : vector<2x96xf32> to vector<2x32xf32>
    %178 = arith.addf %176, %177 : vector<2x32xf32>
    %179 = arith.negf %178 : vector<2x32xf32>
    %180 = math.exp %179 : vector<2x32xf32>
    %cst_52 = arith.constant 1.000000e+00 : f32
    %181 = vector.broadcast %cst_52 : f32 to vector<2x32xf32>
    %182 = arith.addf %181, %180 : vector<2x32xf32>
    %183 = arith.divf %181, %182 : vector<2x32xf32>
    %184 = vector.extract_strided_slice %174 {offsets = [0, 32], sizes = [2, 32], strides = [1, 1]} : vector<2x96xf32> to vector<2x32xf32>
    %185 = vector.extract_strided_slice %175 {offsets = [0, 32], sizes = [2, 32], strides = [1, 1]} : vector<2x96xf32> to vector<2x32xf32>
    %186 = arith.addf %184, %185 : vector<2x32xf32>
    %187 = arith.negf %186 : vector<2x32xf32>
    %188 = math.exp %187 : vector<2x32xf32>
    %cst_53 = arith.constant 1.000000e+00 : f32
    %189 = vector.broadcast %cst_53 : f32 to vector<2x32xf32>
    %190 = arith.addf %189, %188 : vector<2x32xf32>
    %191 = arith.divf %189, %190 : vector<2x32xf32>
    %192 = vector.extract_strided_slice %174 {offsets = [0, 64], sizes = [2, 32], strides = [1, 1]} : vector<2x96xf32> to vector<2x32xf32>
    %193 = vector.extract_strided_slice %175 {offsets = [0, 64], sizes = [2, 32], strides = [1, 1]} : vector<2x96xf32> to vector<2x32xf32>
    %194 = vector.broadcast %1 : vector<1x32xf32> to vector<2x32xf32>
    %195 = arith.addf %193, %194 : vector<2x32xf32>
    %196 = arith.mulf %183, %195 : vector<2x32xf32>
    %197 = arith.addf %192, %196 : vector<2x32xf32>
    %198 = math.tanh %197 : vector<2x32xf32>
    %cst_54 = arith.constant 1.000000e+00 : f32
    %199 = vector.broadcast %cst_54 : f32 to vector<2x32xf32>
    %200 = arith.subf %199, %191 : vector<2x32xf32>
    %201 = arith.mulf %200, %198 : vector<2x32xf32>
    %202 = arith.mulf %191, %169 : vector<2x32xf32>
    %203 = arith.addf %201, %202 : vector<2x32xf32>
    %c0_55 = arith.constant 0 : index
    %c5_56 = arith.constant 5 : index
    %c0_57 = arith.constant 0 : index
    %204 = vector.load %arg3[%c0_55, %c5_56, %c0_57] : memref<2x8x32xf32, #tpu.memory_space<vmem>>, vector<2x1x32xf32>
    %205 = vector.shape_cast %204 : vector<2x1x32xf32> to vector<2x32xf32>
    %206 = vector.shape_cast %203 : vector<2x32xf32> to vector<2x1x32xf32>
    tpu.vector_store %arg3[%c0_55, %c5_56, %c0_57], %206 {strides = array<i32>} : memref<2x8x32xf32, #tpu.memory_space<vmem>>, vector<2x1x32xf32>,
    %c0_58 = arith.constant 0 : index
    %c6 = arith.constant 6 : index
    %c0_59 = arith.constant 0 : index
    %207 = vector.load %arg0[%c0_58, %c6, %c0_59] : memref<2x8x96xf32, #tpu.memory_space<vmem>>, vector<2x1x96xf32>
    %208 = vector.shape_cast %207 : vector<2x1x96xf32> to vector<2x96xf32>
    %cst_60 = arith.constant dense<0.000000e+00> : vector<2x96xf32>
    %209 = tpu.matmul %203, %0, %cst_60 {dimension_numbers = #tpu.dot_dimension_numbers<[1], [0], [0], [1], [0, 0, 1, 1], [], []>} : vector<2x32xf32>, vector<32x96xf32>, vector<2x96xf32> -> vector<2x96xf32>
    %210 = vector.extract_strided_slice %208 {offsets = [0, 0], sizes = [2, 32], strides = [1, 1]} : vector<2x96xf32> to vector<2x32xf32>
    %211 = vector.extract_strided_slice %209 {offsets = [0, 0], sizes = [2, 32], strides = [1, 1]} : vector<2x96xf32> to vector<2x32xf32>
    %212 = arith.addf %210, %211 : vector<2x32xf32>
    %213 = arith.negf %212 : vector<2x32xf32>
    %214 = math.exp %213 : vector<2x32xf32>
    %cst_61 = arith.constant 1.000000e+00 : f32
    %215 = vector.broadcast %cst_61 : f32 to vector<2x32xf32>
    %216 = arith.addf %215, %214 : vector<2x32xf32>
    %217 = arith.divf %215, %216 : vector<2x32xf32>
    %218 = vector.extract_strided_slice %208 {offsets = [0, 32], sizes = [2, 32], strides = [1, 1]} : vector<2x96xf32> to vector<2x32xf32>
    %219 = vector.extract_strided_slice %209 {offsets = [0, 32], sizes = [2, 32], strides = [1, 1]} : vector<2x96xf32> to vector<2x32xf32>
    %220 = arith.addf %218, %219 : vector<2x32xf32>
    %221 = arith.negf %220 : vector<2x32xf32>
    %222 = math.exp %221 : vector<2x32xf32>
    %cst_62 = arith.constant 1.000000e+00 : f32
    %223 = vector.broadcast %cst_62 : f32 to vector<2x32xf32>
    %224 = arith.addf %223, %222 : vector<2x32xf32>
    %225 = arith.divf %223, %224 : vector<2x32xf32>
    %226 = vector.extract_strided_slice %208 {offsets = [0, 64], sizes = [2, 32], strides = [1, 1]} : vector<2x96xf32> to vector<2x32xf32>
    %227 = vector.extract_strided_slice %209 {offsets = [0, 64], sizes = [2, 32], strides = [1, 1]} : vector<2x96xf32> to vector<2x32xf32>
    %228 = vector.broadcast %1 : vector<1x32xf32> to vector<2x32xf32>
    %229 = arith.addf %227, %228 : vector<2x32xf32>
    %230 = arith.mulf %217, %229 : vector<2x32xf32>
    %231 = arith.addf %226, %230 : vector<2x32xf32>
    %232 = math.tanh %231 : vector<2x32xf32>
    %cst_63 = arith.constant 1.000000e+00 : f32
    %233 = vector.broadcast %cst_63 : f32 to vector<2x32xf32>
    %234 = arith.subf %233, %225 : vector<2x32xf32>
    %235 = arith.mulf %234, %232 : vector<2x32xf32>
    %236 = arith.mulf %225, %203 : vector<2x32xf32>
    %237 = arith.addf %235, %236 : vector<2x32xf32>
    %c0_64 = arith.constant 0 : index
    %c6_65 = arith.constant 6 : index
    %c0_66 = arith.constant 0 : index
    %238 = vector.load %arg3[%c0_64, %c6_65, %c0_66] : memref<2x8x32xf32, #tpu.memory_space<vmem>>, vector<2x1x32xf32>
    %239 = vector.shape_cast %238 : vector<2x1x32xf32> to vector<2x32xf32>
    %240 = vector.shape_cast %237 : vector<2x32xf32> to vector<2x1x32xf32>
    tpu.vector_store %arg3[%c0_64, %c6_65, %c0_66], %240 {strides = array<i32>} : memref<2x8x32xf32, #tpu.memory_space<vmem>>, vector<2x1x32xf32>,
    %c0_67 = arith.constant 0 : index
    %c7 = arith.constant 7 : index
    %c0_68 = arith.constant 0 : index
    %241 = vector.load %arg0[%c0_67, %c7, %c0_68] : memref<2x8x96xf32, #tpu.memory_space<vmem>>, vector<2x1x96xf32>
    %242 = vector.shape_cast %241 : vector<2x1x96xf32> to vector<2x96xf32>
    %cst_69 = arith.constant dense<0.000000e+00> : vector<2x96xf32>
    %243 = tpu.matmul %237, %0, %cst_69 {dimension_numbers = #tpu.dot_dimension_numbers<[1], [0], [0], [1], [0, 0, 1, 1], [], []>} : vector<2x32xf32>, vector<32x96xf32>, vector<2x96xf32> -> vector<2x96xf32>
    %244 = vector.extract_strided_slice %242 {offsets = [0, 0], sizes = [2, 32], strides = [1, 1]} : vector<2x96xf32> to vector<2x32xf32>
    %245 = vector.extract_strided_slice %243 {offsets = [0, 0], sizes = [2, 32], strides = [1, 1]} : vector<2x96xf32> to vector<2x32xf32>
    %246 = arith.addf %244, %245 : vector<2x32xf32>
    %247 = arith.negf %246 : vector<2x32xf32>
    %248 = math.exp %247 : vector<2x32xf32>
    %cst_70 = arith.constant 1.000000e+00 : f32
    %249 = vector.broadcast %cst_70 : f32 to vector<2x32xf32>
    %250 = arith.addf %249, %248 : vector<2x32xf32>
    %251 = arith.divf %249, %250 : vector<2x32xf32>
    %252 = vector.extract_strided_slice %242 {offsets = [0, 32], sizes = [2, 32], strides = [1, 1]} : vector<2x96xf32> to vector<2x32xf32>
    %253 = vector.extract_strided_slice %243 {offsets = [0, 32], sizes = [2, 32], strides = [1, 1]} : vector<2x96xf32> to vector<2x32xf32>
    %254 = arith.addf %252, %253 : vector<2x32xf32>
    %255 = arith.negf %254 : vector<2x32xf32>
    %256 = math.exp %255 : vector<2x32xf32>
    %cst_71 = arith.constant 1.000000e+00 : f32
    %257 = vector.broadcast %cst_71 : f32 to vector<2x32xf32>
    %258 = arith.addf %257, %256 : vector<2x32xf32>
    %259 = arith.divf %257, %258 : vector<2x32xf32>
    %260 = vector.extract_strided_slice %242 {offsets = [0, 64], sizes = [2, 32], strides = [1, 1]} : vector<2x96xf32> to vector<2x32xf32>
    %261 = vector.extract_strided_slice %243 {offsets = [0, 64], sizes = [2, 32], strides = [1, 1]} : vector<2x96xf32> to vector<2x32xf32>
    %262 = vector.broadcast %1 : vector<1x32xf32> to vector<2x32xf32>
    %263 = arith.addf %261, %262 : vector<2x32xf32>
    %264 = arith.mulf %251, %263 : vector<2x32xf32>
    %265 = arith.addf %260, %264 : vector<2x32xf32>
    %266 = math.tanh %265 : vector<2x32xf32>
    %cst_72 = arith.constant 1.000000e+00 : f32
    %267 = vector.broadcast %cst_72 : f32 to vector<2x32xf32>
    %268 = arith.subf %267, %259 : vector<2x32xf32>
    %269 = arith.mulf %268, %266 : vector<2x32xf32>
    %270 = arith.mulf %259, %237 : vector<2x32xf32>
    %271 = arith.addf %269, %270 : vector<2x32xf32>
    %c0_73 = arith.constant 0 : index
    %c7_74 = arith.constant 7 : index
    %c0_75 = arith.constant 0 : index
    %272 = vector.load %arg3[%c0_73, %c7_74, %c0_75] : memref<2x8x32xf32, #tpu.memory_space<vmem>>, vector<2x1x32xf32>
    %273 = vector.shape_cast %272 : vector<2x1x32xf32> to vector<2x32xf32>
    %274 = vector.shape_cast %271 : vector<2x32xf32> to vector<2x1x32xf32>
    tpu.vector_store %arg3[%c0_73, %c7_74, %c0_75], %274 {strides = array<i32>} : memref<2x8x32xf32, #tpu.memory_space<vmem>>, vector<2x1x32xf32>,
    %c0_76 = arith.constant 0 : index
    %c0_77 = arith.constant 0 : index
    %275 = vector.load %arg4[%c0_76, %c0_77] : memref<2x32xf32, #tpu.memory_space<vmem>>, vector<2x32xf32>
    tpu.vector_store %arg4[%c0_76, %c0_77], %271 {strides = array<i32>} : memref<2x32xf32, #tpu.memory_space<vmem>>, vector<2x32xf32>,
    return
  }
}

</mosaic_0001>

<bundles_post_ra>
// kernel: encoder_forward.1
= control target key start
LH: loop header
LB: loop body
LE: loop exit
PB: predicated region body
PF: predicated region fallthrough
CT: control target
= control target key end

     0   :  { %10 = vsyncpa [#allocation3], 0  ;;  %s1506_s0 = inlined_call_operand.vmem [shape: f32[2,8,96], index: 0, kind: input, shape index: {}]   ;;  %s1507_s1 = inlined_call_operand.vmem [shape: f32[32,96], index: 1, kind: input, shape index: {}]   ;;  %s1508_s2 = inlined_call_operand.vmem [shape: f32[1,32], index: 2, kind: input, shape index: {}]   ;;  %s1509_s3 = inlined_call_operand.hbm [shape: f32[2,8,32], index: 3, kind: output, shape index: {0}]   ;;  %s1510_s4 = inlined_call_operand.hbm [shape: f32[2,32], index: 4, kind: output, shape index: {1}]  }
   0x1   :  { %v21_v0 = vld [vmem:[%s1507_s1 + $0x18] sm:$0xff]  ;;  %v20_v1 = vld [vmem:[%s1507_s1 + $0x10] sm:$0xff]  ;;  %v1067_v2 = vld [vmem:[%s1508_s2] ss:$0 sm:$0xff] }
   0x2   :  { %41 = vmatpush.msra.mxu0 %v21_v0  ;;  %169 = vmatpush.msra.mxu1 %v21_v0  ;;  %v19_v3 = vld [vmem:[%s1507_s1 + $0x8] sm:$0xff] }
   0x3   :  { %290 = vmatpush.msra.mxu2 %v21_v0  ;;  %411 = vmatpush.msra.mxu3 %v21_v0 }
   0x4   :  { %11 = vsyncpa [#allocation5], 0  ;;  %42 = vmatpush.msra.mxu0 %v20_v1  ;;  %s1216_s23 = smov 64   ;;  %v18_v4 = vld [vmem:[%s1507_s1] sm:$0xff]  ;;  %170 = vmatpush.msra.mxu1 %v20_v1  ;;  %v1217_v5 = vmov 0.0   ;;  %s1218_s28 = smov 96  }
   0x5   :  { %95 = vrot.lane.b32.xlu0 %v1067_v2, %s1216_s23  ;;  %291 = vmatpush.msra.mxu2 %v20_v1  ;;  %v23_v10 = vld [vmem:[%s1506_s0] sm:$0x1]  ;;  %v24_v12 = vld [vmem:[%s1506_s0 + $0x8] sm:$0x1]  ;;  %vm151_vm8 = vcmask 1041409   ;;  %vm25_vm9 = vcmask 261120  }
   0x6   :  { %43 = vmatpush.msra.mxu0 %v19_v3  ;;  %412 = vmatpush.msra.mxu3 %v20_v1  ;;  %s1009_s6 = sshll.u32 %s1509_s3, 4  ;;  %s1220_s7 = smov [#allocation4]   ;;  %s1010_s6 = int_to_ptr.hbm [resolvable:$true] %s1009_s6 }
   0x7   :  { %171 = vmatpush.msra.mxu1 %v19_v3  ;;  %292 = vmatpush.msra.mxu2 %v19_v3  ;;  %s1021_s8 = sshll.u32 %s1220_s7, 4  ;;  %s1023_s11 = sshll.u32 %s1510_s4, 4  ;;  %s1022_s8 = int_to_ptr.vmem [resolvable:$true] %s1021_s8  ;;  %s1024_s11 = int_to_ptr.hbm [resolvable:$true] %s1023_s11 }
   0x8   :  { %44 = vmatpush.msra.mxu0 %v18_v4  ;;  %413 = vmatpush.msra.mxu3 %v19_v3  ;;  %s1221_s12 = smov 128   ;;  %s1222_s13 = smov 8  }
   0x9   :  { %45 = vmatmul.f32.vlgmr.msra.gmra.mxu0 %v1217_v5  ;;  %172 = vmatpush.msra.mxu1 %v18_v4 }
   0xa   :  { %293 = vmatpush.msra.mxu2 %v18_v4  ;;  %414 = vmatpush.msra.mxu3 %v18_v4 }
   0xb   :  { %532 = vmatpush.msrb.mxu0 %v21_v0  ;;  %653 = vmatpush.msrb.mxu1 %v21_v0 }
   0xc   :  { %774 = vmatpush.msrb.mxu2 %v21_v0  ;;  %895 = vmatpush.msrb.mxu3 %v21_v0 }
   0xd   :  { %533 = vmatpush.msrb.mxu0 %v20_v1  ;;  %654 = vmatpush.msrb.mxu1 %v20_v1 }
   0xe   :  { %775 = vmatpush.msrb.mxu2 %v20_v1  ;;  %896 = vmatpush.msrb.mxu3 %v20_v1 }
   0xf   :  { %534 = vmatpush.msrb.mxu0 %v19_v3  ;;  %655 = vmatpush.msrb.mxu1 %v19_v3 }
  0x10   :  { %776 = vmatpush.msrb.mxu2 %v19_v3  ;;  %897 = vmatpush.msrb.mxu3 %v19_v3 }
  0x11   :  { %535 = vmatpush.msrb.mxu0 %v18_v4  ;;  %656 = vmatpush.msrb.mxu1 %v18_v4 }
  0x12   :  { %777 = vmatpush.msrb.mxu2 %v18_v4  ;;  %898 = vmatpush.msrb.mxu3 %v18_v4  ;;  %v149_v4 = vld [vmem:[%s1506_s0 + $0x9] sm:$0x1] }
  0x77   :  { %v1264_v6 = vpop.permute.xlu0 %95 }
  0x86   :  { %v46_v7 = vpop.f32.mrf.mxu0 }
  0x87   :  { %v98_v8 = vadd.f32 %v1264_v6, %v46_v7  ;;  %v50_v11 = vrot.slane %v46_v7, 1  ;;  %v53_v13 = vadd.f32 %v46_v7, %v23_v10 }
  0x89   :  { %101 = vrot.lane.b32.xlu1 %v98_v8, %s1216_s23  ;;  %v100_v9 = vrot.slane %v98_v8, 1  ;;  %v54_v14 = vadd.f32 %v50_v11, %v24_v12  ;;  %v1037_v15 = vmul.f32 -1.442695, %v53_v13 }
  0x8b   :  { %103 = vrot.lane.b32.xlu0 %v100_v9, %s1216_s23  ;;  %v1038_v16 = vmul.f32 -1.442695, %v54_v14  ;;  %1068 = vpow2.f32 %v1037_v15 }
  0x8d   :  { %1070 = vpow2.f32 %v1038_v16 }
  0x91   :  { %v1069_v17 = vpop.eup %1068 }
  0x92   :  { %v61_v19 = vadd.f32 1.0, %v1069_v17 }
  0x93   :  { %v1071_v18 = vpop.eup %1070 }
  0x94   :  { %v62_v20 = vadd.f32 1.0, %v1071_v18  ;;  %1072 = vrcp.f32 %v61_v19  ;;  %v74_v30 = vand.u32 2147483648, %v61_v19  ;;  %vm68_vm1 = vweird.f32 %v61_v19 }
  0x95   :  { %v72_v31 = vand.u32 2147483647, %v61_v19 }
  0x96   :  { %1074 = vrcp.f32 %v62_v20  ;;  %v89_v33 = vand.u32 2147483648, %v62_v20  ;;  %vm83_vm4 = vweird.f32 %v62_v20  ;;  %v87_v35 = vand.u32 2147483647, %v62_v20 }
  0x97   :  { %v75_v36 = vor.u32 1.1754944e-38, %v74_v30  ;;  %vm73_vm6 = vcmp.eq.f32.partialorder %v72_v31, 8.507059e+37 }
  0x98   :  { %v90_v40 = vor.u32 1.1754944e-38, %v89_v33  ;;  %vm88_vm7 = vcmp.eq.f32.partialorder %v87_v35, 8.507059e+37 }
  0x9a   :  { %v1073_v21 = vpop.eup %1072 }
  0x9b   :  { %v64_v23 = vmul.f32 %v1073_v21, %v61_v19  ;;  %vm69_vm0 = vweird.f32 %v1073_v21 }
  0x9c   :  { %v1075_v22 = vpop.eup %1074  ;;  %vm70_vm3 = vmor %vm68_vm1, %vm69_vm0 }
  0x9d   :  { %v79_v24 = vmul.f32 %v1075_v22, %v62_v20  ;;  %v65_v25 = vsub.f32 1.0, %v64_v23  ;;  %vm84_vm2 = vweird.f32 %v1075_v22 }
  0x9e   :  { %vm85_vm5 = vmor %vm83_vm4, %vm84_vm2 }
  0x9f   :  { %v80_v26 = vsub.f32 1.0, %v79_v24  ;;  %v66_v27 = vmul.f32 %v1073_v21, %v65_v25 }
  0xa1   :  { %v81_v28 = vmul.f32 %v1075_v22, %v80_v26  ;;  %v67_v29 = vadd.f32 %v1073_v21, %v66_v27 }
  0xa3   :  { %v82_v32 = vadd.f32 %v1075_v22, %v81_v28  ;;  %v71_v34 = vsel %vm70_vm3, %v1073_v21, %v67_v29 }
  0xa4   :  { %v76_v39 = vsel %vm73_vm6, %v75_v36, %v71_v34 }
  0xa5   :  { %v86_v37 = vsel %vm85_vm5, %v1075_v22, %v82_v32  ;;  %v121_v52 = vsub.f32 1.0, %v76_v39  ;;  %v133_v58 = vmul.f32 0.0, %v76_v39 }
  0xa6   :  { %v91_v43 = vsel %vm88_vm7, %v90_v40, %v86_v37 }
  0xa7   :  { %v122_v53 = vsub.f32 1.0, %v91_v43  ;;  %v134_v56 = vmul.f32 0.0, %v91_v43 }
  0xfb   :  { %v102_v38 = vpop.permute.xlu1 %101 }
  0xfc   :  { %v107_v41 = vmul.f32 %v102_v38, %v76_v39 }
  0xfd   :  { %v104_v42 = vpop.permute.xlu0 %103 }
  0xfe   :  { %v108_v44 = vmul.f32 %v104_v42, %v91_v43  ;;  %111 = vrot.lane.b32.xlu2 %v107_v41, %s1216_s23 }
 0x100   :  { %113 = vrot.lane.b32.xlu1 %v108_v44, %s1216_s23 }
 0x158   :  { %v112_v45 = vpop.permute.xlu2 %111 }
 0x159   :  { %v117_v46 = vadd.f32 %v112_v45, %v23_v10  ;;  %v148_v10 = vld [vmem:[%s1506_s0 + $0x1] sm:$0x1] }
 0x15b   :  { %1076 = vtanh.f32 %v117_v46 }
 0x161   :  { %v1077_v47 = vpop.eup %1076 }
 0x162   :  { %125 = vrot.lane.b32.xlu0 %v1077_v47, %s1218_s28 }
 0x172   :  { %v114_v48 = vpop.permute.xlu1 %113 }
 0x173   :  { %v118_v49 = vadd.f32 %v114_v48, %v24_v12 }
 0x175   :  { %1078 = vtanh.f32 %v118_v49 }
 0x17b   :  { %v1079_v50 = vpop.eup %1078 }
 0x17c   :  { %127 = vrot.lane.b32.xlu2 %v1079_v50, %s1218_s28 }
 0x1d4   :  { %v126_v51 = vpop.permute.xlu0 %125 }
 0x1d5   :  { %v131_v55 = vmul.f32 %v126_v51, %v121_v52 }
 0x1d6   :  { %v128_v54 = vpop.permute.xlu2 %127 }
 0x1d7   :  { %v132_v57 = vmul.f32 %v128_v54, %v122_v53  ;;  %v1281_v60 = vadd.f32 %v133_v58, %v131_v55 }
 0x1d9   :  { %v1279_v59 = vadd.f32 %v134_v56, %v132_v57 }
 0x1db   :  { %v150_v61 = vrot.slane %v1279_v59, 7 }
 0x1dd   :  { %v152_v62 = vsel %vm151_vm8, %v150_v61, %v1281_v60 }
 0x1de   :  { %153 = vrot.lane.b32.xlu1 %v152_v62, %s1218_s28 }
 0x250   :  { %v154_v63 = vpop.permute.xlu1 %153 }
 0x251   :  { %1039 = vmatmul.msk.f32.vlgmr.msra.gmra.mxu1 %vm25_vm9, %v154_v63  ;;  %v270_v63 = vld [vmem:[%s1506_s0 + $0x2] sm:$0x1] }
 0x2ce   :  { %v174_v0 = vpop.f32.mrf.mxu1 }
 0x2cf   :  { %v221_v1 = vadd.f32 %v174_v0, %v1264_v6  ;;  %v178_v3 = vrot.slane %v174_v0, 1  ;;  %v181_v11 = vadd.f32 %v174_v0, %v148_v10 }
 0x2d1   :  { %224 = vrot.lane.b32.xlu0 %v221_v1, %s1216_s23  ;;  %v223_v2 = vrot.slane %v221_v1, 1  ;;  %v182_v5 = vadd.f32 %v178_v3, %v149_v4  ;;  %v1040_v12 = vmul.f32 -1.442695, %v181_v11  ;;  %v271_v1 = vld [vmem:[%s1506_s0 + $0xa] sm:$0x1] }
 0x2d3   :  { %226 = vrot.lane.b32.xlu2 %v223_v2, %s1216_s23  ;;  %v1041_v7 = vmul.f32 -1.442695, %v182_v5 }
 0x2d5   :  { %1080 = vpow2.f32 %v1041_v7 }
 0x2db   :  { %v1081_v8 = vpop.eup %1080 }
 0x2dc   :  { %v190_v9 = vadd.f32 1.0, %v1081_v8 }
 0x2de   :  { %1082 = vrcp.f32 %v190_v9  ;;  %v217_v20 = vand.u32 2147483648, %v190_v9  ;;  %vm211_vm11 = vweird.f32 %v190_v9  ;;  %v215_v21 = vand.u32 2147483647, %v190_v9 }
 0x2df   :  { %1084 = vpow2.f32 %v1040_v12 }
 0x2e0   :  { %v218_v23 = vor.u32 1.1754944e-38, %v217_v20  ;;  %vm216_vm13 = vcmp.eq.f32.partialorder %v215_v21, 8.507059e+37 }
 0x2e4   :  { %v1083_v13 = vpop.eup %1082 }
 0x2e5   :  { %v207_v14 = vmul.f32 %v1083_v13, %v190_v9  ;;  %v1085_v16 = vpop.eup %1084  ;;  %vm212_vm10 = vweird.f32 %v1083_v13 }
 0x2e6   :  { %v189_v18 = vadd.f32 1.0, %v1085_v16  ;;  %vm213_vm12 = vmor %vm211_vm11, %vm212_vm10 }
 0x2e7   :  { %v208_v15 = vsub.f32 1.0, %v207_v14 }
 0x2e8   :  { %1086 = vrcp.f32 %v189_v18  ;;  %v202_v32 = vand.u32 2147483648, %v189_v18  ;;  %vm196_vm15 = vweird.f32 %v189_v18  ;;  %v200_v33 = vand.u32 2147483647, %v189_v18 }
 0x2e9   :  { %v209_v17 = vmul.f32 %v1083_v13, %v208_v15 }
 0x2ea   :  { %v203_v35 = vor.u32 1.1754944e-38, %v202_v32  ;;  %vm201_vm1 = vcmp.eq.f32.partialorder %v200_v33, 8.507059e+37 }
 0x2eb   :  { %v210_v19 = vadd.f32 %v1083_v13, %v209_v17 }
 0x2ed   :  { %v214_v22 = vsel %vm213_vm12, %v1083_v13, %v210_v19 }
 0x2ee   :  { %v1087_v24 = vpop.eup %1086  ;;  %v219_v26 = vsel %vm216_vm13, %v218_v23, %v214_v22 }
 0x2ef   :  { %v192_v28 = vmul.f32 %v1087_v24, %v189_v18  ;;  %vm197_vm14 = vweird.f32 %v1087_v24  ;;  %v245_v47 = vsub.f32 1.0, %v219_v26  ;;  %v257_v50 = vmul.f32 %v219_v26, %v1279_v59 }
 0x2f0   :  { %vm198_vm0 = vmor %vm196_vm15, %vm197_vm14 }
 0x2f1   :  { %v193_v29 = vsub.f32 1.0, %v192_v28 }
 0x2f3   :  { %v194_v30 = vmul.f32 %v1087_v24, %v193_v29 }
 0x2f5   :  { %v195_v31 = vadd.f32 %v1087_v24, %v194_v30 }
 0x2f7   :  { %v199_v34 = vsel %vm198_vm0, %v1087_v24, %v195_v31 }
 0x2f8   :  { %v204_v37 = vsel %vm201_vm1, %v203_v35, %v199_v34 }
 0x2f9   :  { %v244_v46 = vsub.f32 1.0, %v204_v37  ;;  %v256_v52 = vmul.f32 %v204_v37, %v1281_v60 }
 0x32d   :  { %v227_v25 = vpop.permute.xlu2 %226 }
 0x32e   :  { %v231_v27 = vmul.f32 %v227_v25, %v219_v26 }
 0x330   :  { %236 = vrot.lane.b32.xlu1 %v231_v27, %s1216_s23 }
 0x343   :  { %v225_v36 = vpop.permute.xlu0 %224 }
 0x344   :  { %v230_v38 = vmul.f32 %v225_v36, %v204_v37 }
 0x346   :  { %234 = vrot.lane.b32.xlu2 %v230_v38, %s1216_s23 }
 0x3a0   :  { %v235_v39 = vpop.permute.xlu2 %234 }
 0x3a1   :  { %v240_v40 = vadd.f32 %v235_v39, %v148_v10 }
 0x3a2   :  { %v237_v41 = vpop.permute.xlu1 %236 }
 0x3a3   :  { %1088 = vtanh.f32 %v240_v40  ;;  %v241_v42 = vadd.f32 %v237_v41, %v149_v4 }
 0x3a5   :  { %1090 = vtanh.f32 %v241_v42 }
 0x3a9   :  { %v1089_v43 = vpop.eup %1088 }
 0x3aa   :  { %248 = vrot.lane.b32.xlu1 %v1089_v43, %s1218_s28 }
 0x3ab   :  { %v1091_v44 = vpop.eup %1090 }
 0x3ac   :  { %250 = vrot.lane.b32.xlu0 %v1091_v44, %s1218_s28 }
 0x41c   :  { %v249_v45 = vpop.permute.xlu1 %248 }
 0x41d   :  { %v254_v49 = vmul.f32 %v249_v45, %v244_v46 }
 0x41e   :  { %v251_v48 = vpop.permute.xlu0 %250 }
 0x41f   :  { %v255_v51 = vmul.f32 %v251_v48, %v245_v47  ;;  %v1305_v54 = vadd.f32 %v256_v52, %v254_v49 }
 0x421   :  { %v1303_v53 = vadd.f32 %v257_v50, %v255_v51 }
 0x423   :  { %v272_v55 = vrot.slane %v1303_v53, 7 }
 0x425   :  { %v273_v56 = vsel %vm151_vm8, %v272_v55, %v1305_v54 }
 0x426   :  { %274 = vrot.lane.b32.xlu2 %v273_v56, %s1218_s28 }
 0x480   :  { %v275_v57 = vpop.permute.xlu2 %274 }
 0x481   :  { %1042 = vmatmul.msk.f32.vlgmr.msra.gmra.mxu2 %vm25_vm9, %v275_v57 }
 0x504   :  { %v295_v58 = vpop.f32.mrf.mxu2 }
 0x505   :  { %v342_v61 = vadd.f32 %v295_v58, %v1264_v6  ;;  %v299_v0 = vrot.slane %v295_v58, 1  ;;  %v302_v2 = vadd.f32 %v295_v58, %v270_v63 }
 0x507   :  { %345 = vrot.lane.b32.xlu1 %v342_v61, %s1216_s23  ;;  %v344_v62 = vrot.slane %v342_v61, 1  ;;  %v303_v3 = vadd.f32 %v299_v0, %v271_v1  ;;  %v1043_v4 = vmul.f32 -1.442695, %v302_v2  ;;  %v391_v61 = vld [vmem:[%s1506_s0 + $0x3] sm:$0x1] }
 0x509   :  { %347 = vrot.lane.b32.xlu0 %v344_v62, %s1216_s23  ;;  %v1044_v5 = vmul.f32 -1.442695, %v303_v3  ;;  %1092 = vpow2.f32 %v1043_v4  ;;  %v392_v3 = vld [vmem:[%s1506_s0 + $0xb] sm:$0x1] }
 0x50b   :  { %1094 = vpow2.f32 %v1044_v5 }
 0x50f   :  { %v1093_v7 = vpop.eup %1092 }
 0x510   :  { %v310_v9 = vadd.f32 1.0, %v1093_v7 }
 0x511   :  { %v1095_v8 = vpop.eup %1094 }
 0x512   :  { %v311_v10 = vadd.f32 1.0, %v1095_v8  ;;  %1096 = vrcp.f32 %v310_v9  ;;  %v323_v20 = vand.u32 2147483648, %v310_v9  ;;  %vm317_vm3 = vweird.f32 %v310_v9 }
 0x513   :  { %v321_v21 = vand.u32 2147483647, %v310_v9 }
 0x514   :  { %1098 = vrcp.f32 %v311_v10  ;;  %v338_v23 = vand.u32 2147483648, %v311_v10  ;;  %vm332_vm6 = vweird.f32 %v311_v10  ;;  %v336_v25 = vand.u32 2147483647, %v311_v10 }
 0x515   :  { %v324_v26 = vor.u32 1.1754944e-38, %v323_v20  ;;  %vm322_vm10 = vcmp.eq.f32.partialorder %v321_v21, 8.507059e+37 }
 0x516   :  { %v339_v30 = vor.u32 1.1754944e-38, %v338_v23  ;;  %vm337_vm11 = vcmp.eq.f32.partialorder %v336_v25, 8.507059e+37 }
 0x518   :  { %v1097_v11 = vpop.eup %1096 }
 0x519   :  { %v313_v13 = vmul.f32 %v1097_v11, %v310_v9  ;;  %vm318_vm2 = vweird.f32 %v1097_v11 }
 0x51a   :  { %v1099_v12 = vpop.eup %1098  ;;  %vm319_vm5 = vmor %vm317_vm3, %vm318_vm2 }
 0x51b   :  { %v328_v14 = vmul.f32 %v1099_v12, %v311_v10  ;;  %v314_v15 = vsub.f32 1.0, %v313_v13  ;;  %vm333_vm4 = vweird.f32 %v1099_v12 }
 0x51c   :  { %vm334_vm7 = vmor %vm332_vm6, %vm333_vm4 }
 0x51d   :  { %v329_v16 = vsub.f32 1.0, %v328_v14  ;;  %v315_v17 = vmul.f32 %v1097_v11, %v314_v15 }
 0x51f   :  { %v330_v18 = vmul.f32 %v1099_v12, %v329_v16  ;;  %v316_v19 = vadd.f32 %v1097_v11, %v315_v17 }
 0x521   :  { %v331_v22 = vadd.f32 %v1099_v12, %v330_v18  ;;  %v320_v24 = vsel %vm319_vm5, %v1097_v11, %v316_v19 }
 0x522   :  { %v325_v29 = vsel %vm322_vm10, %v324_v26, %v320_v24 }
 0x523   :  { %v335_v27 = vsel %vm334_vm7, %v1099_v12, %v331_v22  ;;  %v365_v42 = vsub.f32 1.0, %v325_v29  ;;  %v377_v48 = vmul.f32 %v325_v29, %v1305_v54 }
 0x524   :  { %v340_v33 = vsel %vm337_vm11, %v339_v30, %v335_v27 }
 0x525   :  { %v366_v43 = vsub.f32 1.0, %v340_v33  ;;  %v378_v46 = vmul.f32 %v340_v33, %v1303_v53 }
 0x579   :  { %v346_v28 = vpop.permute.xlu1 %345 }
 0x57a   :  { %v351_v31 = vmul.f32 %v346_v28, %v325_v29 }
 0x57b   :  { %v348_v32 = vpop.permute.xlu0 %347 }
 0x57c   :  { %v352_v34 = vmul.f32 %v348_v32, %v340_v33  ;;  %355 = vrot.lane.b32.xlu0 %v351_v31, %s1216_s23 }
 0x57e   :  { %357 = vrot.lane.b32.xlu2 %v352_v34, %s1216_s23 }
 0x5d8   :  { %v358_v35 = vpop.permute.xlu2 %357 }
 0x5d9   :  { %v362_v36 = vadd.f32 %v358_v35, %v271_v1 }
 0x5db   :  { %1100 = vtanh.f32 %v362_v36 }
 0x5e1   :  { %v1101_v37 = vpop.eup %1100 }
 0x5e2   :  { %371 = vrot.lane.b32.xlu1 %v1101_v37, %s1218_s28 }
 0x5ee   :  { %v356_v38 = vpop.permute.xlu0 %355 }
 0x5ef   :  { %v361_v39 = vadd.f32 %v356_v38, %v270_v63 }
 0x5f1   :  { %1102 = vtanh.f32 %v361_v39 }
 0x5f7   :  { %v1103_v40 = vpop.eup %1102 }
 0x5f8   :  { %369 = vrot.lane.b32.xlu2 %v1103_v40, %s1218_s28 }
 0x652   :  { %v370_v41 = vpop.permute.xlu2 %369 }
 0x653   :  { %v375_v45 = vmul.f32 %v370_v41, %v365_v42 }
 0x654   :  { %v372_v44 = vpop.permute.xlu1 %371 }
 0x655   :  { %v376_v47 = vmul.f32 %v372_v44, %v366_v43  ;;  %v1329_v50 = vadd.f32 %v377_v48, %v375_v45 }
 0x657   :  { %v1327_v49 = vadd.f32 %v378_v46, %v376_v47 }
 0x659   :  { %v393_v51 = vrot.slane %v1327_v49, 7 }
 0x65b   :  { %v394_v52 = vsel %vm151_vm8, %v393_v51, %v1329_v50 }
 0x65c   :  { %395 = vrot.lane.b32.xlu0 %v394_v52, %s1218_s28 }
 0x6ce   :  { %v396_v55 = vpop.permute.xlu0 %395 }
 0x6cf   :  { %1045 = vmatmul.msk.f32.vlgmr.msra.gmra.mxu3 %vm25_vm9, %v396_v55 }
 0x752   :  { %v416_v56 = vpop.f32.mrf.mxu3 }
 0x753   :  { %v463_v57 = vadd.f32 %v416_v56, %v1264_v6  ;;  %v423_v62 = vadd.f32 %v416_v56, %v391_v61  ;;  %v420_v2 = vrot.slane %v416_v56, 1 }
 0x755   :  { %466 = vrot.lane.b32.xlu2 %v463_v57, %s1216_s23  ;;  %v465_v58 = vrot.slane %v463_v57, 1  ;;  %v1046_v63 = vmul.f32 -1.442695, %v423_v62  ;;  %v424_v4 = vadd.f32 %v420_v2, %v392_v3  ;;  %v513_v62 = vld [vmem:[%s1506_s0 + $0xc] sm:$0x1] }
 0x757   :  { %468 = vrot.lane.b32.xlu1 %v465_v58, %s1216_s23  ;;  %1104 = vpow2.f32 %v1046_v63  ;;  %v1047_v7 = vmul.f32 -1.442695, %v424_v4 }
 0x75d   :  { %v1105_v0 = vpop.eup %1104 }
 0x75e   :  { %v431_v1 = vadd.f32 1.0, %v1105_v0 }
 0x760   :  { %1106 = vrcp.f32 %v431_v1  ;;  %v444_v14 = vand.u32 2147483648, %v431_v1  ;;  %vm438_vm13 = vweird.f32 %v431_v1  ;;  %v442_v15 = vand.u32 2147483647, %v431_v1 }
 0x761   :  { %1108 = vpow2.f32 %v1047_v7 }
 0x762   :  { %v445_v17 = vor.u32 1.1754944e-38, %v444_v14  ;;  %vm443_vm15 = vcmp.eq.f32.partialorder %v442_v15, 8.507059e+37 }
 0x766   :  { %v1107_v5 = vpop.eup %1106 }
 0x767   :  { %v434_v8 = vmul.f32 %v1107_v5, %v431_v1  ;;  %v1109_v11 = vpop.eup %1108  ;;  %vm439_vm12 = vweird.f32 %v1107_v5 }
 0x768   :  { %v432_v13 = vadd.f32 1.0, %v1109_v11  ;;  %vm440_vm14 = vmor %vm438_vm13, %vm439_vm12 }
 0x769   :  { %v435_v9 = vsub.f32 1.0, %v434_v8 }
 0x76a   :  { %1110 = vrcp.f32 %v432_v13  ;;  %v459_v26 = vand.u32 2147483648, %v432_v13  ;;  %vm453_vm1 = vweird.f32 %v432_v13  ;;  %v457_v27 = vand.u32 2147483647, %v432_v13 }
 0x76b   :  { %v436_v10 = vmul.f32 %v1107_v5, %v435_v9 }
 0x76c   :  { %v460_v29 = vor.u32 1.1754944e-38, %v459_v26  ;;  %vm458_vm3 = vcmp.eq.f32.partialorder %v457_v27, 8.507059e+37 }
 0x76d   :  { %v437_v12 = vadd.f32 %v1107_v5, %v436_v10 }
 0x76f   :  { %v441_v16 = vsel %vm440_vm14, %v1107_v5, %v437_v12 }
 0x770   :  { %v446_v19 = vsel %vm443_vm15, %v445_v17, %v441_v16  ;;  %v1111_v21 = vpop.eup %1110 }
 0x771   :  { %v449_v22 = vmul.f32 %v1111_v21, %v432_v13  ;;  %vm454_vm0 = vweird.f32 %v1111_v21  ;;  %v486_v40 = vsub.f32 1.0, %v446_v19  ;;  %v498_v46 = vmul.f32 %v446_v19, %v1329_v50 }
 0x772   :  { %vm455_vm2 = vmor %vm453_vm1, %vm454_vm0 }
 0x773   :  { %v450_v23 = vsub.f32 1.0, %v449_v22 }
 0x775   :  { %v451_v24 = vmul.f32 %v1111_v21, %v450_v23 }
 0x777   :  { %v452_v25 = vadd.f32 %v1111_v21, %v451_v24 }
 0x779   :  { %v456_v28 = vsel %vm455_vm2, %v1111_v21, %v452_v25 }
 0x77a   :  { %v461_v31 = vsel %vm458_vm3, %v460_v29, %v456_v28 }
 0x77b   :  { %v487_v41 = vsub.f32 1.0, %v461_v31  ;;  %v499_v44 = vmul.f32 %v461_v31, %v1327_v49 }
 0x7af   :  { %v467_v18 = vpop.permute.xlu2 %466 }
 0x7b0   :  { %v472_v20 = vmul.f32 %v467_v18, %v446_v19 }
 0x7b2   :  { %476 = vrot.lane.b32.xlu1 %v472_v20, %s1216_s23 }
 0x7c9   :  { %v469_v30 = vpop.permute.xlu1 %468 }
 0x7ca   :  { %v473_v32 = vmul.f32 %v469_v30, %v461_v31 }
 0x7cc   :  { %478 = vrot.lane.b32.xlu0 %v473_v32, %s1216_s23 }
 0x824   :  { %v477_v33 = vpop.permute.xlu1 %476 }
 0x825   :  { %v482_v34 = vadd.f32 %v477_v33, %v391_v61 }
 0x827   :  { %1112 = vtanh.f32 %v482_v34 }
 0x82d   :  { %v1113_v35 = vpop.eup %1112 }
 0x82e   :  { %490 = vrot.lane.b32.xlu0 %v1113_v35, %s1218_s28 }
 0x83e   :  { %v479_v36 = vpop.permute.xlu0 %478 }
 0x83f   :  { %v483_v37 = vadd.f32 %v479_v36, %v392_v3  ;;  %v512_v3 = vld [vmem:[%s1506_s0 + $0x4] sm:$0x1] }
 0x841   :  { %1114 = vtanh.f32 %v483_v37 }
 0x847   :  { %v1115_v38 = vpop.eup %1114 }
 0x848   :  { %492 = vrot.lane.b32.xlu2 %v1115_v38, %s1218_s28 }
 0x8a0   :  { %v491_v39 = vpop.permute.xlu0 %490 }
 0x8a1   :  { %v496_v43 = vmul.f32 %v491_v39, %v486_v40 }
 0x8a2   :  { %v493_v42 = vpop.permute.xlu2 %492 }
 0x8a3   :  { %v497_v45 = vmul.f32 %v493_v42, %v487_v41  ;;  %v1353_v48 = vadd.f32 %v498_v46, %v496_v43 }
 0x8a5   :  { %v1351_v47 = vadd.f32 %v499_v44, %v497_v45 }
 0x8a7   :  { %v514_v51 = vrot.slane %v1351_v47, 7 }
 0x8a9   :  { %v515_v52 = vsel %vm151_vm8, %v514_v51, %v1353_v48 }
 0x8aa   :  { %516 = vrot.lane.b32.xlu1 %v515_v52, %s1218_s28 }
 0x91c   :  { %v517_v55 = vpop.permute.xlu1 %516 }
 0x91d   :  { %1048 = vmatmul.msk.f32.vlgmr.msrb.gmra.mxu0 %vm25_vm9, %v517_v55 }
 0x99a   :  { %v537_v56 = vpop.f32.mrf.mxu0 }
 0x99b   :  { %v584_v57 = vadd.f32 %v537_v56, %v1264_v6  ;;  %v541_v61 = vrot.slane %v537_v56, 1  ;;  %v544_v4 = vadd.f32 %v537_v56, %v512_v3 }
 0x99d   :  { %v586_v58 = vrot.slane %v584_v57, 1  ;;  %587 = vrot.lane.b32.xlu0 %v584_v57, %s1216_s23  ;;  %v545_v63 = vadd.f32 %v541_v61, %v513_v62  ;;  %v1049_v5 = vmul.f32 -1.442695, %v544_v4 }
 0x99f   :  { %589 = vrot.lane.b32.xlu2 %v586_v58, %s1216_s23  ;;  %v1050_v0 = vmul.f32 -1.442695, %v545_v63  ;;  %v633_v63 = vld [vmem:[%s1506_s0 + $0x5] sm:$0x1] }
 0x9a1   :  { %1116 = vpow2.f32 %v1050_v0 }
 0x9a7   :  { %v1117_v1 = vpop.eup %1116 }
 0x9a8   :  { %v553_v2 = vadd.f32 1.0, %v1117_v1  ;;  %v634_v1 = vld [vmem:[%s1506_s0 + $0xd] sm:$0x1] }
 0x9aa   :  { %1118 = vrcp.f32 %v553_v2  ;;  %v580_v14 = vand.u32 2147483648, %v553_v2  ;;  %vm574_vm5 = vweird.f32 %v553_v2  ;;  %v578_v15 = vand.u32 2147483647, %v553_v2 }
 0x9ab   :  { %1120 = vpow2.f32 %v1049_v5 }
 0x9ac   :  { %v581_v17 = vor.u32 1.1754944e-38, %v580_v14  ;;  %vm579_vm7 = vcmp.eq.f32.partialorder %v578_v15, 8.507059e+37 }
 0x9b0   :  { %v1119_v7 = vpop.eup %1118 }
 0x9b1   :  { %v570_v8 = vmul.f32 %v1119_v7, %v553_v2  ;;  %v1121_v10 = vpop.eup %1120  ;;  %vm575_vm4 = vweird.f32 %v1119_v7 }
 0x9b2   :  { %v552_v12 = vadd.f32 1.0, %v1121_v10  ;;  %vm576_vm6 = vmor %vm574_vm5, %vm575_vm4 }
 0x9b3   :  { %v571_v9 = vsub.f32 1.0, %v570_v8 }
 0x9b4   :  { %1122 = vrcp.f32 %v552_v12  ;;  %v565_v26 = vand.u32 2147483648, %v552_v12  ;;  %vm559_vm11 = vweird.f32 %v552_v12  ;;  %v563_v27 = vand.u32 2147483647, %v552_v12 }
 0x9b5   :  { %v572_v11 = vmul.f32 %v1119_v7, %v571_v9 }
 0x9b6   :  { %v566_v29 = vor.u32 1.1754944e-38, %v565_v26  ;;  %vm564_vm13 = vcmp.eq.f32.partialorder %v563_v27, 8.507059e+37 }
 0x9b7   :  { %v573_v13 = vadd.f32 %v1119_v7, %v572_v11 }
 0x9b9   :  { %v577_v16 = vsel %vm576_vm6, %v1119_v7, %v573_v13 }
 0x9ba   :  { %v1123_v18 = vpop.eup %1122  ;;  %v582_v20 = vsel %vm579_vm7, %v581_v17, %v577_v16 }
 0x9bb   :  { %v555_v22 = vmul.f32 %v1123_v18, %v552_v12  ;;  %vm560_vm10 = vweird.f32 %v1123_v18  ;;  %v608_v41 = vsub.f32 1.0, %v582_v20  ;;  %v620_v44 = vmul.f32 %v582_v20, %v1351_v47 }
 0x9bc   :  { %vm561_vm12 = vmor %vm559_vm11, %vm560_vm10 }
 0x9bd   :  { %v556_v23 = vsub.f32 1.0, %v555_v22 }
 0x9bf   :  { %v557_v24 = vmul.f32 %v1123_v18, %v556_v23 }
 0x9c1   :  { %v558_v25 = vadd.f32 %v1123_v18, %v557_v24 }
 0x9c3   :  { %v562_v28 = vsel %vm561_vm12, %v1123_v18, %v558_v25 }
 0x9c4   :  { %v567_v31 = vsel %vm564_vm13, %v566_v29, %v562_v28 }
 0x9c5   :  { %v607_v40 = vsub.f32 1.0, %v567_v31  ;;  %v619_v46 = vmul.f32 %v567_v31, %v1353_v48 }
 0x9f9   :  { %v590_v19 = vpop.permute.xlu2 %589 }
 0x9fa   :  { %v594_v21 = vmul.f32 %v590_v19, %v582_v20 }
 0x9fc   :  { %599 = vrot.lane.b32.xlu1 %v594_v21, %s1216_s23 }
 0xa0f   :  { %v588_v30 = vpop.permute.xlu0 %587 }
 0xa10   :  { %v593_v32 = vmul.f32 %v588_v30, %v567_v31 }
 0xa12   :  { %597 = vrot.lane.b32.xlu2 %v593_v32, %s1216_s23 }
 0xa6c   :  { %v598_v33 = vpop.permute.xlu2 %597 }
 0xa6d   :  { %v603_v34 = vadd.f32 %v598_v33, %v512_v3 }
 0xa6e   :  { %v600_v35 = vpop.permute.xlu1 %599 }
 0xa6f   :  { %1124 = vtanh.f32 %v603_v34  ;;  %v604_v36 = vadd.f32 %v600_v35, %v513_v62 }
 0xa71   :  { %1126 = vtanh.f32 %v604_v36 }
 0xa75   :  { %v1125_v37 = vpop.eup %1124 }
 0xa76   :  { %611 = vrot.lane.b32.xlu1 %v1125_v37, %s1218_s28 }
 0xa77   :  { %v1127_v38 = vpop.eup %1126 }
 0xa78   :  { %613 = vrot.lane.b32.xlu0 %v1127_v38, %s1218_s28 }
 0xae8   :  { %v612_v39 = vpop.permute.xlu1 %611 }
 0xae9   :  { %v617_v43 = vmul.f32 %v612_v39, %v607_v40 }
 0xaea   :  { %v614_v42 = vpop.permute.xlu0 %613 }
 0xaeb   :  { %v618_v45 = vmul.f32 %v614_v42, %v608_v41  ;;  %v1377_v52 = vadd.f32 %v619_v46, %v617_v43 }
 0xaed   :  { %v1375_v51 = vadd.f32 %v620_v44, %v618_v45 }
 0xaef   :  { %v635_v55 = vrot.slane %v1375_v51, 7 }
 0xaf1   :  { %v636_v56 = vsel %vm151_vm8, %v635_v55, %v1377_v52 }
 0xaf2   :  { %637 = vrot.lane.b32.xlu2 %v636_v56, %s1218_s28 }
 0xb4c   :  { %v638_v57 = vpop.permute.xlu2 %637 }
 0xb4d   :  { %1051 = vmatmul.msk.f32.vlgmr.msrb.gmra.mxu1 %vm25_vm9, %v638_v57 }
 0xbca   :  { %v658_v58 = vpop.f32.mrf.mxu1 }
 0xbcb   :  { %v705_v61 = vadd.f32 %v658_v58, %v1264_v6  ;;  %v662_v0 = vrot.slane %v658_v58, 1  ;;  %v665_v2 = vadd.f32 %v658_v58, %v633_v63 }
 0xbcd   :  { %v707_v62 = vrot.slane %v705_v61, 1  ;;  %708 = vrot.lane.b32.xlu1 %v705_v61, %s1216_s23  ;;  %v666_v3 = vadd.f32 %v662_v0, %v634_v1  ;;  %v1052_v4 = vmul.f32 -1.442695, %v665_v2 }
 0xbcf   :  { %710 = vrot.lane.b32.xlu0 %v707_v62, %s1216_s23  ;;  %v1053_v5 = vmul.f32 -1.442695, %v666_v3  ;;  %1128 = vpow2.f32 %v1052_v4  ;;  %v754_v3 = vld [vmem:[%s1506_s0 + $0x6] sm:$0x1] }
 0xbd1   :  { %1130 = vpow2.f32 %v1053_v5 }
 0xbd5   :  { %v1129_v7 = vpop.eup %1128 }
 0xbd6   :  { %v673_v9 = vadd.f32 1.0, %v1129_v7 }
 0xbd7   :  { %v1131_v8 = vpop.eup %1130 }
 0xbd8   :  { %v674_v10 = vadd.f32 1.0, %v1131_v8  ;;  %1132 = vrcp.f32 %v673_v9  ;;  %v686_v20 = vand.u32 2147483648, %v673_v9  ;;  %vm680_vm15 = vweird.f32 %v673_v9 }
 0xbd9   :  { %v684_v21 = vand.u32 2147483647, %v673_v9 }
 0xbda   :  { %1134 = vrcp.f32 %v674_v10  ;;  %v701_v23 = vand.u32 2147483648, %v674_v10  ;;  %vm695_vm2 = vweird.f32 %v674_v10  ;;  %v699_v25 = vand.u32 2147483647, %v674_v10 }
 0xbdb   :  { %v687_v26 = vor.u32 1.1754944e-38, %v686_v20  ;;  %vm685_vm4 = vcmp.eq.f32.partialorder %v684_v21, 8.507059e+37 }
 0xbdc   :  { %v702_v30 = vor.u32 1.1754944e-38, %v701_v23  ;;  %vm700_vm5 = vcmp.eq.f32.partialorder %v699_v25, 8.507059e+37 }
 0xbde   :  { %v1133_v11 = vpop.eup %1132 }
 0xbdf   :  { %v676_v13 = vmul.f32 %v1133_v11, %v673_v9  ;;  %vm681_vm14 = vweird.f32 %v1133_v11 }
 0xbe0   :  { %v1135_v12 = vpop.eup %1134  ;;  %vm682_vm1 = vmor %vm680_vm15, %vm681_vm14 }
 0xbe1   :  { %v691_v14 = vmul.f32 %v1135_v12, %v674_v10  ;;  %v677_v15 = vsub.f32 1.0, %v676_v13  ;;  %vm696_vm0 = vweird.f32 %v1135_v12  ;;  %v755_v10 = vld [vmem:[%s1506_s0 + $0xe] sm:$0x1] }
 0xbe2   :  { %vm697_vm3 = vmor %vm695_vm2, %vm696_vm0 }
 0xbe3   :  { %v692_v16 = vsub.f32 1.0, %v691_v14  ;;  %v678_v17 = vmul.f32 %v1133_v11, %v677_v15 }
 0xbe5   :  { %v693_v18 = vmul.f32 %v1135_v12, %v692_v16  ;;  %v679_v19 = vadd.f32 %v1133_v11, %v678_v17 }
 0xbe7   :  { %v694_v22 = vadd.f32 %v1135_v12, %v693_v18  ;;  %v683_v24 = vsel %vm682_vm1, %v1133_v11, %v679_v19 }
 0xbe8   :  { %v688_v29 = vsel %vm685_vm4, %v687_v26, %v683_v24 }
 0xbe9   :  { %v698_v27 = vsel %vm697_vm3, %v1135_v12, %v694_v22  ;;  %v728_v42 = vsub.f32 1.0, %v688_v29  ;;  %v740_v56 = vmul.f32 %v688_v29, %v1377_v52 }
 0xbea   :  { %v703_v33 = vsel %vm700_vm5, %v702_v30, %v698_v27 }
 0xbeb   :  { %v729_v43 = vsub.f32 1.0, %v703_v33  ;;  %v741_v46 = vmul.f32 %v703_v33, %v1375_v51 }
 0xc3f   :  { %v709_v28 = vpop.permute.xlu1 %708 }
 0xc40   :  { %v714_v31 = vmul.f32 %v709_v28, %v688_v29 }
 0xc41   :  { %v711_v32 = vpop.permute.xlu0 %710 }
 0xc42   :  { %v715_v34 = vmul.f32 %v711_v32, %v703_v33  ;;  %718 = vrot.lane.b32.xlu0 %v714_v31, %s1216_s23 }
 0xc44   :  { %720 = vrot.lane.b32.xlu2 %v715_v34, %s1216_s23 }
 0xc9e   :  { %v721_v35 = vpop.permute.xlu2 %720 }
 0xc9f   :  { %v725_v36 = vadd.f32 %v721_v35, %v634_v1 }
 0xca1   :  { %1136 = vtanh.f32 %v725_v36 }
 0xca7   :  { %v1137_v37 = vpop.eup %1136 }
 0xca8   :  { %734 = vrot.lane.b32.xlu1 %v1137_v37, %s1218_s28 }
 0xcb4   :  { %v719_v38 = vpop.permute.xlu0 %718 }
 0xcb5   :  { %v724_v39 = vadd.f32 %v719_v38, %v633_v63 }
 0xcb7   :  { %1138 = vtanh.f32 %v724_v39 }
 0xcbd   :  { %v1139_v40 = vpop.eup %1138 }
 0xcbe   :  { %732 = vrot.lane.b32.xlu2 %v1139_v40, %s1218_s28 }
 0xd18   :  { %v733_v41 = vpop.permute.xlu2 %732 }
 0xd19   :  { %v738_v45 = vmul.f32 %v733_v41, %v728_v42 }
 0xd1a   :  { %v735_v44 = vpop.permute.xlu1 %734 }
 0xd1b   :  { %v739_v55 = vmul.f32 %v735_v44, %v729_v43  ;;  %v1401_v58 = vadd.f32 %v740_v56, %v738_v45 }
 0xd1d   :  { %v1399_v57 = vadd.f32 %v741_v46, %v739_v55 }
 0xd1f   :  { %v756_v61 = vrot.slane %v1399_v57, 7 }
 0xd21   :  { %v757_v62 = vsel %vm151_vm8, %v756_v61, %v1401_v58 }
 0xd22   :  { %758 = vrot.lane.b32.xlu0 %v757_v62, %s1218_s28 }
 0xd94   :  { %v759_v63 = vpop.permute.xlu0 %758 }
 0xd95   :  { %1054 = vmatmul.msk.f32.vlgmr.msrb.gmra.mxu2 %vm25_vm9, %v759_v63 }
 0xe18   :  { %v779_v0 = vpop.f32.mrf.mxu2 }
 0xe19   :  { %v826_v1 = vadd.f32 %v779_v0, %v1264_v6  ;;  %v786_v4 = vadd.f32 %v779_v0, %v754_v3  ;;  %v783_v9 = vrot.slane %v779_v0, 1 }
 0xe1b   :  { %v828_v2 = vrot.slane %v826_v1, 1  ;;  %829 = vrot.lane.b32.xlu2 %v826_v1, %s1216_s23  ;;  %v1055_v5 = vmul.f32 -1.442695, %v786_v4  ;;  %v787_v11 = vadd.f32 %v783_v9, %v755_v10 }
 0xe1d   :  { %831 = vrot.lane.b32.xlu1 %v828_v2, %s1216_s23  ;;  %1140 = vpow2.f32 %v1055_v5  ;;  %v1056_v13 = vmul.f32 -1.442695, %v787_v11  ;;  %v876_v11 = vld [vmem:[%s1506_s0 + $0xf] sm:$0x1] }
 0xe23   :  { %v1141_v7 = vpop.eup %1140 }
 0xe24   :  { %v794_v8 = vadd.f32 1.0, %v1141_v7 }
 0xe26   :  { %1142 = vrcp.f32 %v794_v8  ;;  %v807_v20 = vand.u32 2147483648, %v794_v8  ;;  %vm801_vm7 = vweird.f32 %v794_v8  ;;  %v805_v21 = vand.u32 2147483647, %v794_v8 }
 0xe27   :  { %1144 = vpow2.f32 %v1056_v13 }
 0xe28   :  { %v808_v23 = vor.u32 1.1754944e-38, %v807_v20  ;;  %vm806_vm11 = vcmp.eq.f32.partialorder %v805_v21, 8.507059e+37 }
 0xe2c   :  { %v1143_v12 = vpop.eup %1142 }
 0xe2d   :  { %v797_v14 = vmul.f32 %v1143_v12, %v794_v8  ;;  %v1145_v17 = vpop.eup %1144  ;;  %vm802_vm6 = vweird.f32 %v1143_v12 }
 0xe2e   :  { %v795_v19 = vadd.f32 1.0, %v1145_v17  ;;  %vm803_vm10 = vmor %vm801_vm7, %vm802_vm6  ;;  %vm145_vm7 = vcmask 253952  }
 0xe2f   :  { %v798_v15 = vsub.f32 1.0, %v797_v14 }
 0xe30   :  { %1146 = vrcp.f32 %v795_v19  ;;  %v822_v32 = vand.u32 2147483648, %v795_v19  ;;  %vm816_vm13 = vweird.f32 %v795_v19  ;;  %v820_v33 = vand.u32 2147483647, %v795_v19 }
 0xe31   :  { %v799_v16 = vmul.f32 %v1143_v12, %v798_v15 }
 0xe32   :  { %v823_v35 = vor.u32 1.1754944e-38, %v822_v32  ;;  %vm821_vm15 = vcmp.eq.f32.partialorder %v820_v33, 8.507059e+37 }
 0xe33   :  { %v800_v18 = vadd.f32 %v1143_v12, %v799_v16  ;;  %v875_v16 = vld [vmem:[%s1506_s0 + $0x7] sm:$0x1]  ;;  %s1219_s0 = smov [#allocation2]  }
 0xe35   :  { %v804_v22 = vsel %vm803_vm10, %v1143_v12, %v800_v18 }
 0xe36   :  { %v809_v25 = vsel %vm806_vm11, %v808_v23, %v804_v22  ;;  %v1147_v27 = vpop.eup %1146 }
 0xe37   :  { %v812_v28 = vmul.f32 %v1147_v27, %v795_v19  ;;  %vm817_vm12 = vweird.f32 %v1147_v27  ;;  %v849_v46 = vsub.f32 1.0, %v809_v25  ;;  %v861_v0 = vmul.f32 %v809_v25, %v1401_v58 }
 0xe38   :  { %vm818_vm14 = vmor %vm816_vm13, %vm817_vm12 }
 0xe39   :  { %v813_v29 = vsub.f32 1.0, %v812_v28 }
 0xe3b   :  { %v814_v30 = vmul.f32 %v1147_v27, %v813_v29 }
 0xe3d   :  { %v815_v31 = vadd.f32 %v1147_v27, %v814_v30 }
 0xe3f   :  { %v819_v34 = vsel %vm818_vm14, %v1147_v27, %v815_v31 }
 0xe40   :  { %v824_v37 = vsel %vm821_vm15, %v823_v35, %v819_v34 }
 0xe41   :  { %v850_v55 = vsub.f32 1.0, %v824_v37  ;;  %v862_v62 = vmul.f32 %v824_v37, %v1399_v57 }
 0xe75   :  { %v830_v24 = vpop.permute.xlu2 %829 }
 0xe76   :  { %v835_v26 = vmul.f32 %v830_v24, %v809_v25 }
 0xe78   :  { %839 = vrot.lane.b32.xlu1 %v835_v26, %s1216_s23 }
 0xe8f   :  { %v832_v36 = vpop.permute.xlu1 %831 }
 0xe90   :  { %v836_v38 = vmul.f32 %v832_v36, %v824_v37 }
 0xe92   :  { %841 = vrot.lane.b32.xlu0 %v836_v38, %s1216_s23 }
 0xeea   :  { %v840_v39 = vpop.permute.xlu1 %839 }
 0xeeb   :  { %v845_v40 = vadd.f32 %v840_v39, %v754_v3 }
 0xeed   :  { %1148 = vtanh.f32 %v845_v40 }
 0xef3   :  { %v1149_v41 = vpop.eup %1148 }
 0xef4   :  { %853 = vrot.lane.b32.xlu0 %v1149_v41, %s1218_s28 }
 0xf04   :  { %v842_v42 = vpop.permute.xlu0 %841 }
 0xf05   :  { %v846_v43 = vadd.f32 %v842_v42, %v755_v10 }
 0xf07   :  { %1150 = vtanh.f32 %v846_v43 }
 0xf0d   :  { %v1151_v44 = vpop.eup %1150 }
 0xf0e   :  { %855 = vrot.lane.b32.xlu2 %v1151_v44, %s1218_s28 }
 0xf66   :  { %v854_v45 = vpop.permute.xlu0 %853 }
 0xf67   :  { %v859_v61 = vmul.f32 %v854_v45, %v849_v46 }
 0xf68   :  { %v856_v56 = vpop.permute.xlu2 %855 }
 0xf69   :  { %v860_v63 = vmul.f32 %v856_v56, %v850_v55  ;;  %v1425_v2 = vadd.f32 %v861_v0, %v859_v61 }
 0xf6b   :  { %v1423_v1 = vadd.f32 %v862_v62, %v860_v63 }
 0xf6d   :  { %v877_v3 = vrot.slane %v1423_v1, 7 }
 0xf6f   :  { %v878_v4 = vsel %vm151_vm8, %v877_v3, %v1425_v2 }
 0xf70   :  { %879 = vrot.lane.b32.xlu1 %v878_v4, %s1218_s28 }
 0xfe2   :  { %v880_v5 = vpop.permute.xlu1 %879 }
 0xfe3   :  { %1057 = vmatmul.msk.f32.vlgmr.msrb.gmra.mxu3 %vm25_vm9, %v880_v5 }
0x1066   :  { %v900_v7 = vpop.f32.mrf.mxu3 }
0x1067   :  { %v947_v8 = vadd.f32 %v900_v7, %v1264_v6  ;;  %v904_v10 = vrot.slane %v900_v7, 1  ;;  %v907_v6 = vadd.f32 %v900_v7, %v875_v16 }
0x1069   :  { %v949_v9 = vrot.slane %v947_v8, 1  ;;  %950 = vrot.lane.b32.xlu0 %v947_v8, %s1216_s23  ;;  %v908_v12 = vadd.f32 %v904_v10, %v876_v11  ;;  %v1058_v17 = vmul.f32 -1.442695, %v907_v6 }
0x106b   :  { %952 = vrot.lane.b32.xlu2 %v949_v9, %s1216_s23  ;;  %v1059_v13 = vmul.f32 -1.442695, %v908_v12 }
0x106d   :  { %1152 = vpow2.f32 %v1059_v13 }
0x1073   :  { %v1153_v14 = vpop.eup %1152 }
0x1074   :  { %v916_v15 = vadd.f32 1.0, %v1153_v14 }
0x1076   :  { %1154 = vrcp.f32 %v916_v15  ;;  %v943_v25 = vand.u32 2147483648, %v916_v15  ;;  %vm937_vm0 = vweird.f32 %v916_v15  ;;  %v941_v26 = vand.u32 2147483647, %v916_v15 }
0x1077   :  { %1156 = vpow2.f32 %v1058_v17 }
0x1078   :  { %v944_v28 = vor.u32 1.1754944e-38, %v943_v25  ;;  %vm942_vm2 = vcmp.eq.f32.partialorder %v941_v26, 8.507059e+37 }
0x107c   :  { %v1155_v18 = vpop.eup %1154 }
0x107d   :  { %v933_v19 = vmul.f32 %v1155_v18, %v916_v15  ;;  %v1157_v21 = vpop.eup %1156  ;;  %vm938_vm9 = vweird.f32 %v1155_v18 }
0x107e   :  { %v915_v23 = vadd.f32 1.0, %v1157_v21  ;;  %vm939_vm1 = vmor %vm937_vm0, %vm938_vm9 }
0x107f   :  { %v934_v20 = vsub.f32 1.0, %v933_v19 }
0x1080   :  { %1158 = vrcp.f32 %v915_v23  ;;  %v928_v37 = vand.u32 2147483648, %v915_v23  ;;  %vm922_vm4 = vweird.f32 %v915_v23  ;;  %v926_v38 = vand.u32 2147483647, %v915_v23 }
0x1081   :  { %v935_v22 = vmul.f32 %v1155_v18, %v934_v20 }
0x1082   :  { %v929_v40 = vor.u32 1.1754944e-38, %v928_v37  ;;  %vm927_vm6 = vcmp.eq.f32.partialorder %v926_v38, 8.507059e+37 }
0x1083   :  { %v936_v24 = vadd.f32 %v1155_v18, %v935_v22 }
0x1085   :  { %v940_v27 = vsel %vm939_vm1, %v1155_v18, %v936_v24 }
0x1086   :  { %v1159_v29 = vpop.eup %1158  ;;  %v1441_v31 = vsel %vm942_vm2, %v944_v28, %v940_v27 }
0x1087   :  { %v918_v33 = vmul.f32 %v1159_v29, %v915_v23  ;;  %vm923_vm3 = vweird.f32 %v1159_v29  ;;  %v971_v62 = vsub.f32 1.0, %v1441_v31  ;;  %v983_v0 = vmul.f32 %v1441_v31, %v1423_v1 }
0x1088   :  { %vm924_vm5 = vmor %vm922_vm4, %vm923_vm3 }
0x1089   :  { %v919_v34 = vsub.f32 1.0, %v918_v33 }
0x108b   :  { %v920_v35 = vmul.f32 %v1159_v29, %v919_v34 }
0x108d   :  { %v921_v36 = vadd.f32 %v1159_v29, %v920_v35 }
0x108f   :  { %v925_v39 = vsel %vm924_vm5, %v1159_v29, %v921_v36 }
0x1090   :  { %v930_v42 = vsel %vm927_vm6, %v929_v40, %v925_v39 }
0x10c5   :  { %v953_v30 = vpop.permute.xlu2 %952 }
0x10c6   :  { %v957_v32 = vmul.f32 %v953_v30, %v1441_v31 }
0x10c8   :  { %962 = vrot.lane.b32.xlu1 %v957_v32, %s1216_s23 }
0x10db   :  { %v951_v41 = vpop.permute.xlu0 %950 }
0x10dc   :  { %v956_v43 = vmul.f32 %v951_v41, %v930_v42 }
0x10de   :  { %960 = vrot.lane.b32.xlu2 %v956_v43, %s1216_s23  ;;  %s1007_s23 = sshll.u32 %s1219_s0, 4  ;;  %s1008_s23 = int_to_ptr.vmem [resolvable:$true] %s1007_s23 }
0x10e6   :  { %139 = vrot.lane.b32.xlu2 %v1281_v60, %s1218_s28 }
0x10ee   :  { %264 = vrot.lane.b32.xlu2 %v1303_v53, %s1218_s28 }
0x10f6   :  { %504 = vrot.lane.b32.xlu2 %v1353_v48, %s1218_s28 }
0x10fe   :  { %627 = vrot.lane.b32.xlu2 %v1375_v51, %s1218_s28 }
0x1106   :  { %867 = vrot.lane.b32.xlu2 %v1425_v2, %s1218_s28 }
0x1138   :  { %v961_v44 = vpop.permute.xlu2 %960 }
0x1139   :  { %v966_v45 = vadd.f32 %v961_v44, %v875_v16 }
0x113a   :  { %v963_v46 = vpop.permute.xlu1 %962 }
0x113b   :  { %1160 = vtanh.f32 %v966_v45  ;;  %v967_v55 = vadd.f32 %v963_v46, %v876_v11 }
0x113d   :  { %1162 = vtanh.f32 %v967_v55 }
0x1140   :  { %v140_v60 = vpop.permute.xlu2 %139 }
0x1141   :  { %v1161_v56 = vpop.eup %1160  ;;  %146 = vst.msk [vmem:[#allocation2] sm:$0x1] %vm145_vm7, %v140_v60 }
0x1142   :  { %974 = vrot.lane.b32.xlu1 %v1161_v56, %s1218_s28 }
0x1143   :  { %v1163_v53 = vpop.eup %1162 }
0x1144   :  { %976 = vrot.lane.b32.xlu0 %v1163_v53, %s1218_s28 }
0x1148   :  { %v265_v48 = vpop.permute.xlu2 %264 }
0x1149   :  { %269 = vst.msk [vmem:[#allocation2 + $0x9] sm:$0x1] %vm145_vm7, %v265_v48 }
0x114a   :  { %262 = vrot.lane.b32.xlu1 %v1305_v54, %s1218_s28 }
0x114c   :  { %141 = vrot.lane.b32.xlu0 %v1279_v59, %s1218_s28  ;;  %v970_v59 = vsub.f32 1.0, %v930_v42 }
0x1150   :  { %v505_v51 = vpop.permute.xlu2 %504 }
0x1151   :  { %510 = vst.msk [vmem:[#allocation2 + $0x3] sm:$0x1] %vm145_vm7, %v505_v51 }
0x1152   :  { %385 = vrot.lane.b32.xlu1 %v1327_v49, %s1218_s28 }
0x1154   :  { %383 = vrot.lane.b32.xlu0 %v1329_v50, %s1218_s28  ;;  %v982_v50 = vmul.f32 %v930_v42, %v1425_v2 }
0x1158   :  { %v628_v61 = vpop.permute.xlu2 %627 }
0x1159   :  { %632 = vst.msk [vmem:[#allocation2 + $0xc] sm:$0x1] %vm145_vm7, %v628_v61 }
0x115a   :  { %625 = vrot.lane.b32.xlu1 %v1377_v52, %s1218_s28 }
0x115c   :  { %506 = vrot.lane.b32.xlu0 %v1351_v47, %s1218_s28 }
0x1160   :  { %v868_v54 = vpop.permute.xlu2 %867 }
0x1161   :  { %873 = vst.msk [vmem:[#allocation2 + $0x6] sm:$0x1] %vm145_vm7, %v868_v54 }
0x1162   :  { %748 = vrot.lane.b32.xlu1 %v1399_v57, %s1218_s28 }
0x1164   :  { %746 = vrot.lane.b32.xlu0 %v1401_v58, %s1218_s28 }
0x116c   :  { %869 = vrot.lane.b32.xlu0 %v1423_v1, %s1218_s28 }
0x11b4   :  { %v975_v49 = vpop.permute.xlu1 %974 }
0x11b5   :  { %v980_v52 = vmul.f32 %v975_v49, %v970_v59 }
0x11b6   :  { %v977_v47 = vpop.permute.xlu0 %976 }
0x11b7   :  { %v984_v63 = vadd.f32 %v982_v50, %v980_v52  ;;  %v981_v3 = vmul.f32 %v977_v47, %v971_v62 }
0x11b9   :  { %v985_v57 = vadd.f32 %v983_v0, %v981_v3  ;;  %988 = vrot.lane.b32.xlu1 %v984_v63, %s1218_s28 }
0x11bb   :  { %v996_v58 = vrot.slane %v985_v57, 7  ;;  %990 = vrot.lane.b32.xlu2 %v985_v57, %s1218_s28 }
0x11bc   :  { %v263_v4 = vpop.permute.xlu1 %262 }
0x11bd   :  { %268 = vst.msk [vmem:[#allocation2 + $0x1] sm:$0x1] %vm145_vm7, %v263_v4  ;;  %v997_v2 = vsel %vm151_vm8, %v996_v58, %v984_v63  ;;  %vm1001_vm8 = vcmask 254976  }
0x11be   :  { %v142_v5 = vpop.permute.xlu0 %141  ;;  %998 = vrot.lane.b32.xlu0 %v997_v2, %s1218_s28 }
0x11bf   :  { %147 = vst.msk [vmem:[#allocation2 + $0x8] sm:$0x1] %vm145_vm7, %v142_v5 }
0x11c4   :  { %v386_v7 = vpop.permute.xlu1 %385 }
0x11c5   :  { %390 = vst.msk [vmem:[#allocation2 + $0xa] sm:$0x1] %vm145_vm7, %v386_v7 }
0x11c6   :  { %v384_v1 = vpop.permute.xlu0 %383 }
0x11c7   :  { %389 = vst.msk [vmem:[#allocation2 + $0x2] sm:$0x1] %vm145_vm7, %v384_v1 }
0x11cc   :  { %v626_v8 = vpop.permute.xlu1 %625 }
0x11cd   :  { %631 = vst.msk [vmem:[#allocation2 + $0x4] sm:$0x1] %vm145_vm7, %v626_v8 }
0x11ce   :  { %v507_v9 = vpop.permute.xlu0 %506 }
0x11cf   :  { %511 = vst.msk [vmem:[#allocation2 + $0xb] sm:$0x1] %vm145_vm7, %v507_v9 }
0x11d4   :  { %v749_v10 = vpop.permute.xlu1 %748 }
0x11d5   :  { %753 = vst.msk [vmem:[#allocation2 + $0xd] sm:$0x1] %vm145_vm7, %v749_v10 }
0x11d6   :  { %v747_v11 = vpop.permute.xlu0 %746 }
0x11d7   :  { %752 = vst.msk [vmem:[#allocation2 + $0x5] sm:$0x1] %vm145_vm7, %v747_v11 }
0x11de   :  { %v870_v12 = vpop.permute.xlu0 %869 }
0x11df   :  { %874 = vst.msk [vmem:[#allocation2 + $0xe] sm:$0x1] %vm145_vm7, %v870_v12 }
0x1215   :  { %v991_v13 = vpop.permute.xlu2 %990 }
0x1216   :  { %995 = vst.msk [vmem:[#allocation2 + $0xf] sm:$0x1] %vm145_vm7, %v991_v13 }
0x122b   :  { %v989_v14 = vpop.permute.xlu1 %988 }
0x122c   :  { %994 = vst.msk [vmem:[#allocation2 + $0x7] sm:$0x1] %vm145_vm7, %v989_v14 }
0x122d   :  { %1015 = dma.vmem_to_hbm [thread:$0]  %s1008_s23, 256, %s1010_s6, [#allocation3], %s1221_s12, %s1221_s12, %s1222_s13  }
0x1230   :  { %v999_v15 = vpop.permute.xlu0 %998 }
0x1231   :  { %1002 = vst.msk [vmem:[#allocation4] sm:$0x3] %vm1001_vm8, %v999_v15 }
0x1232   :  { %1026 = dma.vmem_to_hbm [thread:$0]  %s1022_s8, 32, %s1024_s11, [#allocation5]  }
0x1233   :  { %1212 = dma.done.wait [#allocation3], 256  }
0x1234   :  { %1213 = vsyncadd [#allocation3], 4294967040 }
0x1235   :  { %1214 = dma.done.wait [#allocation5], 32  }
0x1236   :  { %1215 = vsyncadd [#allocation5], 4294967264 }
0x1237   :  { %1035 = vsyncpa [#allocation3], 1 }
0x1238   :  { %1036 = vsyncpa [#allocation5], 1 }

</bundles_post_ra>
